<compile_context>
chip_gen: v7x
topology: tpu7x:2x2x1
jax: 0.10.0
libtpu: 0.0.40
codegen_flags: <defaults>
</compile_context>

<pallas_src>
import jax
import jax.numpy as jnp
from jax import lax
from jax.experimental import pallas as pl
from jax.experimental.pallas import tpu as pltpu


def _policy_kernel(ctx_ref, eos_ref, w_ref, b_ref, ln_a_ref, ln_b_ref,
                   g_ref, n_ref):
    Bb, S, D = ctx_ref.shape
    eps = 1e-6

    # ---- LayerNorm over features (torch.std is unbiased: divide by D-1) ----
    x = ctx_ref[...].astype(jnp.float32).reshape(Bb * S, D)
    mean = jnp.mean(x, axis=-1, keepdims=True)
    var = jnp.sum((x - mean) ** 2, axis=-1, keepdims=True) * (1.0 / (D - 1))
    xn = ln_a_ref[0] * (x - mean) / (jnp.sqrt(var) + eps) + ln_b_ref[0]

    # ---- fused projections: w_ref = [Wk^T | Wq^T / d_model]  (D, 2D) ----
    kq = jnp.dot(xn, w_ref[...], preferred_element_type=jnp.float32) + b_ref[0]
    key = kq[:, :D].reshape(Bb, S, D)
    query = kq[:, D:].reshape(Bb, S, D)     # already scaled by 1/d_model

    # ---- scores = Q K^T / d_model (contract on D, no explicit transpose) ----
    scores = jnp.einsum('bqd,bkd->bqk', query, key,
                        preferred_element_type=jnp.float32)        # (Bb, S, S)

    # ---- structural masks (cheap iota/compare VPU work) ----
    row = lax.broadcasted_iota(jnp.int32, (S, S), 0)
    col = lax.broadcasted_iota(jnp.int32, (S, S), 1)
    band = jnp.logical_or(col == row + 1, col == row - 1)   # super + sub diagonal
    sub_m = (col == row - 1)
    diag = (col == row)
    # prefix-sum operator P[i, k] = 1 if 1 <= k <= i
    pincl = jnp.logical_and(col >= 1, col <= row).astype(jnp.float32)

    valid = jnp.logical_and(band, eos_ref[...] != 0)
    scores = jnp.where(valid, scores, jnp.float32(-1e9))

    # ---- softmax over the last dim ----
    m = jnp.max(scores, axis=-1, keepdims=True)
    e = jnp.exp(scores - m)
    p = e / jnp.sum(e, axis=-1, keepdims=True)

    # ---- symmetric sqrt neighbour attention (symmetric matrix) ----
    neibor = jnp.sqrt(p * jnp.swapaxes(p, -1, -2) + 1e-9)          # (Bb, S, S)

    # ---- g_attn via prefix sums of the band log values ------------------------
    # u[b, i] = neibor[b, i, i-1]  (== super-diag entry neibor[b, i-1, i] by symmetry)
    u = jnp.sum(jnp.where(sub_m, neibor, 0.0), axis=-1, keepdims=True)   # (Bb, S, 1)
    lu = jnp.log(u + 1e-9)                                               # S logs, not S^2
    # cfull[b, i, j] = C[b, i] = sum_{1<=k<=i} lu[b, k]  (independent of j)
    cfull = jnp.einsum('bik,bkj->bij',
                       jnp.broadcast_to(pincl, (Bb, S, S)),
                       jnp.broadcast_to(lu, (Bb, S, S)),
                       preferred_element_type=jnp.float32)               # (Bb, S, S)
    diff = jnp.swapaxes(cfull, -1, -2) - cfull        # C[b, j] - C[b, i]
    expo = jnp.where(col > row, diff, -diff)          # sum of band logs over [min, max)
    # off-diagonal: exp(prefix-sum difference) + 1e-9 ; diagonal: neibor[i, i]
    g = jnp.where(diag, neibor, jnp.exp(expo) + 1e-9)

    g_ref[...] = g
    n_ref[...] = neibor


def _pick_block_b(B, S, D):
    """Largest divisor of B that (a) aims for >=128 rows per projection matmul and
    (b) keeps the per-step block footprint small enough for every TPU generation."""
    target = max(1, 128 // max(S, 1))
    per_b_bytes = S * D * 4 + S * S + 2 * S * S * 4   # ctx + eos(int8) + 2 f32 outputs
    vmem_cap = max(1, (16 << 20) // (4 * per_b_bytes))
    target = min(target, vmem_cap, B)
    bb = 1
    for d in range(1, target + 1):
        if B % d == 0:
            bb = d
    return bb


def policy_network1(context, eos_mask, w_key, b_key, w_query, b_query, ln_a, ln_b):
    B, S, D = context.shape
    Bb = _pick_block_b(B, S, D)

    # Fuse the (pre-transposed) projection weights and fold 1/d_model into the query.
    inv_d = 1.0 / D
    w_fused = jnp.concatenate([w_key.T, w_query.T * inv_d], axis=1)          # (D, 2D)
    b_fused = jnp.concatenate([b_key, b_query * inv_d]).reshape(1, 2 * D)    # (1, 2D)
    ln_a2 = ln_a.reshape(1, D)
    ln_b2 = ln_b.reshape(1, D)
    eos8 = (eos_mask != 0).astype(jnp.int8)    # 4x fewer HBM bytes than int32

    grid_spec = pltpu.PrefetchScalarGridSpec(
        num_scalar_prefetch=0,
        grid=(B // Bb,),
        in_specs=[
            pl.BlockSpec((Bb, S, D), lambda i: (i, 0, 0)),    # context
            pl.BlockSpec((Bb, S, S), lambda i: (i, 0, 0)),    # eos mask (int8)
            pl.BlockSpec((D, 2 * D), lambda i: (0, 0)),       # fused weights
            pl.BlockSpec((1, 2 * D), lambda i: (0, 0)),       # fused bias
            pl.BlockSpec((1, D), lambda i: (0, 0)),           # LayerNorm a_2
            pl.BlockSpec((1, D), lambda i: (0, 0)),           # LayerNorm b_2
        ],
        out_specs=[
            pl.BlockSpec((Bb, S, S), lambda i: (i, 0, 0)),    # g_attn
            pl.BlockSpec((Bb, S, S), lambda i: (i, 0, 0)),    # neibor_attn
        ],
    )

    return pl.pallas_call(
        _policy_kernel,
        out_shape=(jax.ShapeDtypeStruct((B, S, S), jnp.float32),
                   jax.ShapeDtypeStruct((B, S, S), jnp.float32)),
        grid_spec=grid_spec,
        compiler_params=pltpu.CompilerParams(
            dimension_semantics=("parallel",)),
    )(context, eos8, w_fused, b_fused, ln_a2, ln_b2)


def _reference(context, eos_mask, w_key, b_key, w_query, b_query, ln_a, ln_b):
    """Pure-JAX reference mirroring the PyTorch forward (original tri-matmul form)."""
    B, S, D = context.shape
    eps = 1e-6
    mean = jnp.mean(context, -1, keepdims=True)
    std = jnp.sqrt(jnp.sum((context - mean) ** 2, -1, keepdims=True) / (D - 1))
    x = ln_a * (context - mean) / (std + eps) + ln_b

    a = jnp.eye(S, k=1, dtype=jnp.int32)
    b = jnp.eye(S, k=0, dtype=jnp.int32)
    c = jnp.eye(S, k=-1, dtype=jnp.int32)
    tri = jnp.triu(jnp.ones((S, S), jnp.float32), 0)

    mask = jnp.bitwise_and(eos_mask, a + c)
    key = x @ w_key.T + b_key
    query = x @ w_query.T + b_query
    scores = jnp.einsum('bqd,bkd->bqk', query, key) / D
    scores = jnp.where(mask == 0, -1e9, scores)
    neibor = jax.nn.softmax(scores, axis=-1)
    neibor = jnp.sqrt(neibor * jnp.swapaxes(neibor, -2, -1) + 1e-9)
    t = jnp.where(a == 0, 0.0, jnp.log(neibor + 1e-9)) @ tri
    g = jnp.exp(tri @ t)
    g = jnp.where((tri.astype(jnp.int32) - b) == 0, 0.0, g)
    g = g + jnp.swapaxes(g, -2, -1) + jnp.where(b == 0, 1e-9, neibor)
    return g, neibor


if __name__ == "__main__":
    B, S, D = 32, 8, 32   # batch, seq_len, d_model  (Bb=16 -> grid=(2,), 128-row matmuls)

    key = jax.random.PRNGKey(0)
    k_ctx, k_wk, k_bk, k_wq, k_bq = jax.random.split(key, 5)

    context = jax.random.normal(k_ctx, (B, S, D), dtype=jnp.float32)
    # eos_mask: 0/1 int mask, ones except padded tails of a couple of sequences
    eos_mask = jnp.ones((B, S, S), dtype=jnp.int32)
    eos_mask = eos_mask.at[1, :, S - 2:].set(0).at[1, S - 2:, :].set(0)
    eos_mask = eos_mask.at[5, :, S - 3:].set(0).at[5, S - 3:, :].set(0)

    lim = 1.0 / float(D) ** 0.5
    w_key = jax.random.uniform(k_wk, (D, D), jnp.float32, -lim, lim)
    b_key = jax.random.uniform(k_bk, (D,), jnp.float32, -lim, lim)
    w_query = jax.random.uniform(k_wq, (D, D), jnp.float32, -lim, lim)
    b_query = jax.random.uniform(k_bq, (D,), jnp.float32, -lim, lim)
    ln_a = jnp.ones((D,), jnp.float32)   # LayerNorm a_2 init
    ln_b = jnp.zeros((D,), jnp.float32)  # LayerNorm b_2 init

    g_attn, neibor_attn = policy_network1(
        context, eos_mask, w_key, b_key, w_query, b_query, ln_a, ln_b)
    jax.block_until_ready((g_attn, neibor_attn))

    g_ref, n_ref = _reference(
        context, eos_mask, w_key, b_key, w_query, b_query, ln_a, ln_b)
    assert jnp.allclose(neibor_attn, n_ref, atol=2e-5, rtol=1e-4), "neibor_attn mismatch"
    assert jnp.allclose(g_attn, g_ref, atol=1e-4, rtol=1e-4), "g_attn mismatch"

    print("KERNEL_OK")
</pallas_src>

<mosaic_0001>
module attributes {stable_mosaic.version = 11 : i64} {
  func.func @_policy_kernel(%arg0: i32, %arg1: memref<16x8x32xf32, #tpu.memory_space<vmem>>, %arg2: memref<16x8x8xi8, #tpu.memory_space<vmem>>, %arg3: memref<32x64xf32, #tpu.memory_space<vmem>>, %arg4: memref<1x64xf32, #tpu.memory_space<vmem>>, %arg5: memref<1x32xf32, #tpu.memory_space<vmem>>, %arg6: memref<1x32xf32, #tpu.memory_space<vmem>>, %arg7: memref<16x8x8xf32, #tpu.memory_space<vmem>>, %arg8: memref<16x8x8xf32, #tpu.memory_space<vmem>>) attributes {dimension_semantics = [#tpu.dimension_semantics<parallel>], iteration_bounds = array<i64: 2>, scalar_prefetch = 0 : i64, scratch_operands = 0 : i64, tpu.core_type = #tpu.core_type<tc>, window_params = [{transform_indices = @transform_0, window_bounds = array<i64: 16, 8, 32>}, {transform_indices = @transform_1, window_bounds = array<i64: 16, 8, 8>}, {pipeline_mode = #tpu.pipeline_mode<synchronous>, transform_indices = @transform_2, window_bounds = array<i64: 32, 64>}, {pipeline_mode = #tpu.pipeline_mode<synchronous>, transform_indices = @transform_3, window_bounds = array<i64: 1, 64>}, {pipeline_mode = #tpu.pipeline_mode<synchronous>, transform_indices = @transform_4, window_bounds = array<i64: 1, 32>}, {pipeline_mode = #tpu.pipeline_mode<synchronous>, transform_indices = @transform_5, window_bounds = array<i64: 1, 32>}, {transform_indices = @transform_6, window_bounds = array<i64: 16, 8, 8>}, {transform_indices = @transform_7, window_bounds = array<i64: 16, 8, 8>}]} {
    %c0 = arith.constant 0 : index
    %c0_0 = arith.constant 0 : index
    %c0_1 = arith.constant 0 : index
    %0 = vector.load %arg1[%c0, %c0_0, %c0_1] : memref<16x8x32xf32, #tpu.memory_space<vmem>>, vector<16x8x32xf32>
    %1 = vector.shape_cast %0 : vector<16x8x32xf32> to vector<128x32xf32>
    %cst = arith.constant dense<0.000000e+00> : vector<128xf32>
    %2 = vector.multi_reduction <add>, %1, %cst [1] : vector<128x32xf32> to vector<128xf32>
    %3 = vector.shape_cast %2 : vector<128xf32> to vector<128x1xf32>
    %cst_2 = arith.constant 3.200000e+01 : f32
    %4 = vector.broadcast %cst_2 : f32 to vector<128x1xf32>
    %5 = arith.divf %3, %4 : vector<128x1xf32>
    %6 = vector.broadcast %5 : vector<128x1xf32> to vector<128x32xf32>
    %7 = arith.subf %1, %6 : vector<128x32xf32>
    %8 = arith.mulf %7, %7 : vector<128x32xf32>
    %cst_3 = arith.constant dense<0.000000e+00> : vector<128xf32>
    %9 = vector.multi_reduction <add>, %8, %cst_3 [1] : vector<128x32xf32> to vector<128xf32>
    %10 = vector.shape_cast %9 : vector<128xf32> to vector<128x1xf32>
    %cst_4 = arith.constant 0.0322580636 : f32
    %11 = vector.broadcast %cst_4 : f32 to vector<128x1xf32>
    %12 = arith.mulf %10, %11 : vector<128x1xf32>
    %c0_5 = arith.constant 0 : index
    %c0_6 = arith.constant 0 : index
    %13 = vector.load %arg5[%c0_5, %c0_6] : memref<1x32xf32, #tpu.memory_space<vmem>>, vector<1x32xf32>
    %14 = vector.shape_cast %13 : vector<1x32xf32> to vector<32xf32>
    %15 = vector.broadcast %5 : vector<128x1xf32> to vector<128x32xf32>
    %16 = arith.subf %1, %15 : vector<128x32xf32>
    %17 = vector.shape_cast %14 : vector<32xf32> to vector<1x32xf32>
    %18 = vector.broadcast %17 : vector<1x32xf32> to vector<128x32xf32>
    %19 = arith.mulf %18, %16 : vector<128x32xf32>
    %20 = math.sqrt %12 : vector<128x1xf32>
    %cst_7 = arith.constant 9.99999997E-7 : f32
    %21 = vector.broadcast %cst_7 : f32 to vector<128x1xf32>
    %22 = arith.addf %20, %21 : vector<128x1xf32>
    %23 = vector.broadcast %22 : vector<128x1xf32> to vector<128x32xf32>
    %24 = arith.divf %19, %23 : vector<128x32xf32>
    %c0_8 = arith.constant 0 : index
    %c0_9 = arith.constant 0 : index
    %25 = vector.load %arg6[%c0_8, %c0_9] : memref<1x32xf32, #tpu.memory_space<vmem>>, vector<1x32xf32>
    %26 = vector.shape_cast %25 : vector<1x32xf32> to vector<32xf32>
    %27 = vector.shape_cast %26 : vector<32xf32> to vector<1x32xf32>
    %28 = vector.broadcast %27 : vector<1x32xf32> to vector<128x32xf32>
    %29 = arith.addf %24, %28 : vector<128x32xf32>
    %c0_10 = arith.constant 0 : index
    %c0_11 = arith.constant 0 : index
    %30 = vector.load %arg3[%c0_10, %c0_11] : memref<32x64xf32, #tpu.memory_space<vmem>>, vector<32x64xf32>
    %cst_12 = arith.constant dense<0.000000e+00> : vector<128x64xf32>
    %31 = tpu.matmul %29, %30, %cst_12 {dimension_numbers = #tpu.dot_dimension_numbers<[1], [0], [0], [1], [0, 0, 1, 1], [], []>} : vector<128x32xf32>, vector<32x64xf32>, vector<128x64xf32> -> vector<128x64xf32>
    %c0_13 = arith.constant 0 : index
    %c0_14 = arith.constant 0 : index
    %32 = vector.load %arg4[%c0_13, %c0_14] : memref<1x64xf32, #tpu.memory_space<vmem>>, vector<1x64xf32>
    %33 = vector.shape_cast %32 : vector<1x64xf32> to vector<64xf32>
    %34 = vector.shape_cast %33 : vector<64xf32> to vector<1x64xf32>
    %35 = vector.broadcast %34 : vector<1x64xf32> to vector<128x64xf32>
    %36 = arith.addf %31, %35 : vector<128x64xf32>
    %37 = vector.extract_strided_slice %36 {offsets = [0, 0], sizes = [128, 32], strides = [1, 1]} : vector<128x64xf32> to vector<128x32xf32>
    %38 = vector.shape_cast %37 : vector<128x32xf32> to vector<16x8x32xf32>
    %39 = vector.extract_strided_slice %36 {offsets = [0, 32], sizes = [128, 32], strides = [1, 1]} : vector<128x64xf32> to vector<128x32xf32>
    %40 = vector.shape_cast %39 : vector<128x32xf32> to vector<16x8x32xf32>
    "tpu.trace_start"() <{level = 10 : i32, message = "bqd,bkd->bqk"}> : () -> ()
    %cst_15 = arith.constant dense<0.000000e+00> : vector<16x8x8xf32>
    %41 = tpu.matmul %40, %38, %cst_15 {dimension_numbers = #tpu.dot_dimension_numbers<[2], [2], [1], [1], [0, 0, 0, 1, 1, 1], [0], [0]>} : vector<16x8x32xf32>, vector<16x8x32xf32>, vector<16x8x8xf32> -> vector<16x8x8xf32>
    "tpu.trace_stop"() : () -> ()
    %42 = tpu.iota {dimensions = array<i32: 0>} : vector<8x8xi32>
    %43 = tpu.iota {dimensions = array<i32: 1>} : vector<8x8xi32>
    %c1_i32 = arith.constant 1 : i32
    %44 = vector.broadcast %c1_i32 : i32 to vector<8x8xi32>
    %45 = arith.addi %42, %44 : vector<8x8xi32>
    %46 = arith.cmpi eq, %43, %45 : vector<8x8xi32>
    %c1_i32_16 = arith.constant 1 : i32
    %47 = vector.broadcast %c1_i32_16 : i32 to vector<8x8xi32>
    %48 = arith.subi %42, %47 : vector<8x8xi32>
    %49 = arith.cmpi eq, %43, %48 : vector<8x8xi32>
    %50 = arith.ori %46, %49 : vector<8x8xi1>
    %c1_i32_17 = arith.constant 1 : i32
    %51 = vector.broadcast %c1_i32_17 : i32 to vector<8x8xi32>
    %52 = arith.subi %42, %51 : vector<8x8xi32>
    %53 = arith.cmpi eq, %43, %52 : vector<8x8xi32>
    %54 = arith.cmpi eq, %43, %42 : vector<8x8xi32>
    %c1_i32_18 = arith.constant 1 : i32
    %55 = vector.broadcast %c1_i32_18 : i32 to vector<8x8xi32>
    %56 = arith.cmpi sge, %43, %55 : vector<8x8xi32>
    %57 = arith.cmpi sle, %43, %42 : vector<8x8xi32>
    %58 = arith.andi %56, %57 : vector<8x8xi1>
    %59 = arith.extui %58 : vector<8x8xi1> to vector<8x8xi32>
    %60 = arith.sitofp %59 : vector<8x8xi32> to vector<8x8xf32>
    %c0_19 = arith.constant 0 : index
    %c0_20 = arith.constant 0 : index
    %c0_21 = arith.constant 0 : index
    %61 = vector.load %arg2[%c0_19, %c0_20, %c0_21] : memref<16x8x8xi8, #tpu.memory_space<vmem>>, vector<16x8x8xi8>
    %c0_i8 = arith.constant 0 : i8
    %62 = vector.broadcast %c0_i8 : i8 to vector<16x8x8xi8>
    %63 = arith.cmpi ne, %61, %62 : vector<16x8x8xi8>
    %64 = vector.shape_cast %50 : vector<8x8xi1> to vector<1x8x8xi1>
    %65 = vector.broadcast %64 : vector<1x8x8xi1> to vector<16x8x8xi1>
    %66 = arith.andi %65, %63 : vector<16x8x8xi1>
    %cst_22 = arith.constant -1.000000e+09 : f32
    %67 = vector.broadcast %cst_22 : f32 to vector<16x8x8xf32>
    %68 = arith.select %66, %41, %67 : vector<16x8x8xi1>, vector<16x8x8xf32>
    %cst_23 = arith.constant dense<0xFF800000> : vector<16x8xf32>
    %69 = vector.multi_reduction <maximumf>, %68, %cst_23 [2] : vector<16x8x8xf32> to vector<16x8xf32>
    %70 = vector.shape_cast %69 : vector<16x8xf32> to vector<16x8x1xf32>
    %71 = vector.broadcast %70 : vector<16x8x1xf32> to vector<16x8x8xf32>
    %72 = arith.subf %68, %71 : vector<16x8x8xf32>
    %73 = math.exp %72 : vector<16x8x8xf32>
    %cst_24 = arith.constant dense<0.000000e+00> : vector<16x8xf32>
    %74 = vector.multi_reduction <add>, %73, %cst_24 [2] : vector<16x8x8xf32> to vector<16x8xf32>
    %75 = vector.shape_cast %74 : vector<16x8xf32> to vector<16x8x1xf32>
    %76 = vector.broadcast %75 : vector<16x8x1xf32> to vector<16x8x8xf32>
    %77 = arith.divf %73, %76 : vector<16x8x8xf32>
    %78 = tpu.transpose %77, [0, 2, 1] : vector<16x8x8xf32> -> vector<16x8x8xf32>
    %79 = arith.mulf %77, %78 : vector<16x8x8xf32>
    %cst_25 = arith.constant 9.99999971E-10 : f32
    %80 = vector.broadcast %cst_25 : f32 to vector<16x8x8xf32>
    %81 = arith.addf %79, %80 : vector<16x8x8xf32>
    %82 = math.sqrt %81 : vector<16x8x8xf32>
    %cst_26 = arith.constant 0.000000e+00 : f32
    %83 = vector.shape_cast %53 : vector<8x8xi1> to vector<1x8x8xi1>
    %84 = vector.broadcast %83 : vector<1x8x8xi1> to vector<16x8x8xi1>
    %85 = vector.broadcast %cst_26 : f32 to vector<16x8x8xf32>
    %86 = arith.select %84, %82, %85 : vector<16x8x8xi1>, vector<16x8x8xf32>
    %cst_27 = arith.constant dense<0.000000e+00> : vector<16x8xf32>
    %87 = vector.multi_reduction <add>, %86, %cst_27 [2] : vector<16x8x8xf32> to vector<16x8xf32>
    %88 = vector.shape_cast %87 : vector<16x8xf32> to vector<16x8x1xf32>
    %cst_28 = arith.constant 9.99999971E-10 : f32
    %89 = vector.broadcast %cst_28 : f32 to vector<16x8x1xf32>
    %90 = arith.addf %88, %89 : vector<16x8x1xf32>
    %91 = math.log %90 : vector<16x8x1xf32>
    %92 = vector.shape_cast %60 : vector<8x8xf32> to vector<1x8x8xf32>
    %93 = vector.broadcast %92 : vector<1x8x8xf32> to vector<16x8x8xf32>
    %94 = vector.shape_cast %91 : vector<16x8x1xf32> to vector<16x8x1xf32>
    %95 = vector.broadcast %94 : vector<16x8x1xf32> to vector<16x8x8xf32>
    "tpu.trace_start"() <{level = 10 : i32, message = "bik,bkj->bij"}> : () -> ()
    %cst_29 = arith.constant dense<0.000000e+00> : vector<16x8x8xf32>
    %96 = tpu.matmul %93, %95, %cst_29 {dimension_numbers = #tpu.dot_dimension_numbers<[2], [1], [1], [2], [0, 0, 0, 1, 1, 2], [0], [0]>} : vector<16x8x8xf32>, vector<16x8x8xf32>, vector<16x8x8xf32> -> vector<16x8x8xf32>
    "tpu.trace_stop"() : () -> ()
    %97 = tpu.transpose %96, [0, 2, 1] : vector<16x8x8xf32> -> vector<16x8x8xf32>
    %98 = arith.subf %97, %96 : vector<16x8x8xf32>
    %99 = arith.cmpi sgt, %43, %42 : vector<8x8xi32>
    %cst_30 = arith.constant 0.000000e+00 : f32
    %100 = vector.broadcast %cst_30 : f32 to vector<16x8x8xf32>
    %101 = arith.subf %100, %98 : vector<16x8x8xf32>
    %102 = vector.shape_cast %99 : vector<8x8xi1> to vector<1x8x8xi1>
    %103 = vector.broadcast %102 : vector<1x8x8xi1> to vector<16x8x8xi1>
    %104 = arith.select %103, %98, %101 : vector<16x8x8xi1>, vector<16x8x8xf32>
    %105 = math.exp %104 : vector<16x8x8xf32>
    %cst_31 = arith.constant 9.99999971E-10 : f32
    %106 = vector.broadcast %cst_31 : f32 to vector<16x8x8xf32>
    %107 = arith.addf %105, %106 : vector<16x8x8xf32>
    %108 = vector.shape_cast %54 : vector<8x8xi1> to vector<1x8x8xi1>
    %109 = vector.broadcast %108 : vector<1x8x8xi1> to vector<16x8x8xi1>
    %110 = arith.select %109, %82, %107 : vector<16x8x8xi1>, vector<16x8x8xf32>
    %c0_32 = arith.constant 0 : index
    %c0_33 = arith.constant 0 : index
    %c0_34 = arith.constant 0 : index
    %111 = vector.load %arg7[%c0_32, %c0_33, %c0_34] : memref<16x8x8xf32, #tpu.memory_space<vmem>>, vector<16x8x8xf32>
    tpu.vector_store %arg7[%c0_32, %c0_33, %c0_34], %110 {strides = array<i32>} : memref<16x8x8xf32, #tpu.memory_space<vmem>>, vector<16x8x8xf32>,
    %c0_35 = arith.constant 0 : index
    %c0_36 = arith.constant 0 : index
    %c0_37 = arith.constant 0 : index
    %112 = vector.load %arg8[%c0_35, %c0_36, %c0_37] : memref<16x8x8xf32, #tpu.memory_space<vmem>>, vector<16x8x8xf32>
    tpu.vector_store %arg8[%c0_35, %c0_36, %c0_37], %82 {strides = array<i32>} : memref<16x8x8xf32, #tpu.memory_space<vmem>>, vector<16x8x8xf32>,
    return
  }
  func.func @transform_0(%arg0: i32) -> (i32, i32, i32) {
    %c0_i32 = arith.constant 0 : i32
    %c0_i32_0 = arith.constant 0 : i32
    %c0_i32_1 = arith.constant 0 : i32
    return %arg0, %c0_i32, %c0_i32_0 : i32, i32, i32
  }
  func.func @transform_1(%arg0: i32) -> (i32, i32, i32) {
    %c0_i32 = arith.constant 0 : i32
    %c0_i32_0 = arith.constant 0 : i32
    %c0_i32_1 = arith.constant 0 : i32
    return %arg0, %c0_i32, %c0_i32_0 : i32, i32, i32
  }
  func.func @transform_2(%arg0: i32) -> (i32, i32) {
    %c0_i32 = arith.constant 0 : i32
    %c0_i32_0 = arith.constant 0 : i32
    %c0_i32_1 = arith.constant 0 : i32
    return %c0_i32, %c0_i32_0 : i32, i32
  }
  func.func @transform_3(%arg0: i32) -> (i32, i32) {
    %c0_i32 = arith.constant 0 : i32
    %c0_i32_0 = arith.constant 0 : i32
    %c0_i32_1 = arith.constant 0 : i32
    return %c0_i32, %c0_i32_0 : i32, i32
  }
  func.func @transform_4(%arg0: i32) -> (i32, i32) {
    %c0_i32 = arith.constant 0 : i32
    %c0_i32_0 = arith.constant 0 : i32
    %c0_i32_1 = arith.constant 0 : i32
    return %c0_i32, %c0_i32_0 : i32, i32
  }
  func.func @transform_5(%arg0: i32) -> (i32, i32) {
    %c0_i32 = arith.constant 0 : i32
    %c0_i32_0 = arith.constant 0 : i32
    %c0_i32_1 = arith.constant 0 : i32
    return %c0_i32, %c0_i32_0 : i32, i32
  }
  func.func @transform_6(%arg0: i32) -> (i32, i32, i32) {
    %c0_i32 = arith.constant 0 : i32
    %c0_i32_0 = arith.constant 0 : i32
    %c0_i32_1 = arith.constant 0 : i32
    return %arg0, %c0_i32, %c0_i32_0 : i32, i32, i32
  }
  func.func @transform_7(%arg0: i32) -> (i32, i32, i32) {
    %c0_i32 = arith.constant 0 : i32
    %c0_i32_0 = arith.constant 0 : i32
    %c0_i32_1 = arith.constant 0 : i32
    return %arg0, %c0_i32, %c0_i32_0 : i32, i32, i32
  }
}

</mosaic_0001>

<bundles_post_ra>
// kernel: tpu_custom_call.1
= control target key start
LH: loop header
LB: loop body
LE: loop exit
PB: predicated region body
PF: predicated region fallthrough
CT: control target
= control target key end

     0   :  { %13 = vsyncpa [#allocation3], 0  ;;  %s7403_s0 = inlined_call_operand.hbm [shape: f32[32,8,32], index: 0, kind: input, shape index: {}]   ;;  %s7404_s1 = inlined_call_operand.vmem [shape: s8[32,8,8], index: 1, kind: input, shape index: {}]   ;;  %s7405_s2 = inlined_call_operand.vmem [shape: f32[32,64], index: 2, kind: input, shape index: {}]   ;;  %s7406_s3 = inlined_call_operand.vmem [shape: f32[1,64], index: 3, kind: input, shape index: {}]   ;;  %s7407_s4 = inlined_call_operand.vmem [shape: f32[1,32], index: 4, kind: input, shape index: {}]   ;;  %s7408_s5 = inlined_call_operand.vmem [shape: f32[1,32], index: 5, kind: input, shape index: {}]   ;;  %s7409_s6 = inlined_call_operand.vmem [shape: f32[32,8,8], index: 6, kind: output, shape index: {0}]   ;;  %s7410_s7 = inlined_call_operand.vmem [shape: f32[32,8,8], index: 7, kind: output, shape index: {1}]  }
   0x1   :  { %15 = vsyncpa [#allocation3 + $0x1], 0  ;;  %s5885_s24 = smov 0   ;;  %s5887_s25 = smov 0  }
   0x2   :  { %s5889_s26 = smov 0   ;;  %s5891_s27 = smov 0  }
   0x3 LB: > { %s5132_s28 = sadd.s32 4294967295, %s5836_s27   ;;  %s5905_s29 = sadd.s32 1, %s5836_s27   ;;  %s5836_s27 = sphi %s5891_s27, %s7502_s27   ;;  %s5832_s26 = sphi %s5889_s26, %s7501_s26   ;;  %s5828_s25 = sphi %s5887_s25, %s7500_s25   ;;  %s5824_s24 = sphi %s5885_s24, %s7499_s24  }
   0x4   : > { %s25_s30 = ssub.s32 %s5836_s27, %s5905_s29  ;;  %s28_s8 = sadd.s32 1, %s5832_s26 }
   0x5   : > { %p26_p0 = scmp.eq.s32.totalorder %s25_s30, 0  ;;  %p35_p1 = scmp.ne.s32.totalorder %s5832_s26, %s5828_s25 }
   0x6   : > { %p36_p2 = scmp.eq.s32.totalorder %s5836_s27, 0  ;;  %p41_p3 = scmp.ne.s32.totalorder %s5828_s25, %s5824_s24 }
   0x7   : > { %s5915_s9 = scalar_select %p26_p0, %s5832_s26, %s28_s8  }
   0x8   : > { %p37_p4 = por %p36_p2, %p35_p1  ;;  %p42_p5 = scmp.eq.s32.totalorder %s5132_s28, 0 }
   0x9   : > { %p5509_p6 = scmp.lt.s32.totalorder %s5836_s27, 2  ;;  %s239_s11 = sand.u32 1, %s5832_s26  }
   0xa   : > { %p5920_p7 = por %p42_p5, %p41_p3  ;;  %s5136_s12 = sshll.u32 %s239_s11, 7 }
   0xb   : > { %s5218_s13 = sshll.u32 %s5836_s27, 11  ;;  %s243_s17 = scalar_lea.vmem [#allocation2], %s5136_s12 }
   0xc   : > { %s5929_s16 = scalar_lea.hbm %s7403_s0, %s5218_s13  ;;  %s250_s18 = sshll.u32 %s243_s17, 4  ;;  %s5931_s18 = int_to_ptr.vmem [resolvable:$true] %s250_s18 }
   0xd   : > { %p5933_p8 = pnand %p5509_p6, %p37_p4  ;;  %s5938_s20 = scalar_lea.sflag [#allocation3], %s239_s11 }
   0xe   : > { %s5772_s21 = scalar_lea.hbm %s5929_s16, 2048  ;;  %s5777_s24 = scalar_lea.hbm %s7403_s0, 4096 }
   0xf   : > { %p5773_p10 = scmp.ne.s32.totalorder %s5929_s16, %s5772_s21  ;;  %p5774_p11 = pneg %p5933_p8 }
  0x10   : > { %p5778_p0 = scmp.lt.u32.totalorder %s5929_s16, %s7403_s0  ;;  %p5779_p1 = scmp.lt.u32.totalorder %s5777_s24, %s5772_s21 }
  0x11   : > { %p5775_p12 = pnand %p5774_p11, %p5773_p10  ;;  %p5781_p3 = scmp.lt.u32.totalorder %s5772_s21, %s5929_s16 }
  0x12   : > { %p5780_p2 = por %p5779_p1, %p5778_p0 }
  0x13   : > { %p5776_p13 = pneg %p5775_p12 }
  0x14   : > { %p5782_p4 = por %p5781_p3, %p5780_p2 }
  0x16   : > { %p5783_p5 = pnand %p5782_p4, %p5776_p13 }
  0x18   : > { %5786 = shalt.err (!%p5783_p5)
}
  0x19   : > { %s5787_s11 = scalar_lea.vmem %s5931_s18, 2048  ;;  %s5838_s12 = smov [#allocation2]  }
  0x1a   : > { %p5788_p6 = scmp.ne.s32.totalorder %s5931_s18, %s5787_s11  ;;  %s5792_s13 = sshll.u32 %s5838_s12, 4  ;;  %s5793_s13 = int_to_ptr.vmem [resolvable:$false] %s5792_s13 }
  0x1b   : > { %s5794_s14 = scalar_lea.vmem %s5793_s13, 4096  ;;  %p5795_p9 = scmp.lt.s32.totalorder %s5931_s18, %s5793_s13 }
  0x1c   : > { %p5790_p10 = pnand %p5788_p6, %p5774_p11  ;;  %p5796_p0 = scmp.lt.s32.totalorder %s5794_s14, %s5787_s11 }
  0x1e   : > { %p5791_p12 = pneg %p5790_p10  ;;  %p5797_p1 = por %p5796_p0, %p5795_p9 }
  0x20   : > { %p5798_p2 = pnand %p5797_p1, %p5791_p12 }
  0x22   : > { %5801 = shalt.err (!%p5798_p2)
}
  0x23   : > { %s5839_s15 = smov 128   ;;  %s5840_s17 = smov 8  }
  0x24   : > { %5508 = dma.hbm_to_vmem [thread:$0]  (!%p5933_p8), %s5929_s16, 2048, %s5931_s18, %s5938_s20, %s5839_s15, %s5839_s15, %s5840_s17  }
  0x25   : > { %p267_p11 = scmp.lt.s32.totalorder %s5836_s27, 3  ;;  %p7414_p13 = scmp.ge.s32.totalorder %s5836_s27, 1 }
  0x27   : > { %p268_p3 = pnand %p7414_p13, %p267_p11 }
  0x28   : > { %s273_s21 = sand.u32 (!%p268_p3), 1, %s5828_s25  }
  0x29   : > { %271 = sbr.rel (%p268_p3) target bundleno = 1992 (0x7c8), region = 44  ;;  %s5140_s22 = sshll.u32 (!%p268_p3), %s273_s21, 7 }
  0x2a   : > { %s274_s23 = scalar_lea.sflag (!%p268_p3), [#allocation3], %s273_s21  ;;  %s5970_s24 = scalar_lea.vmem (!%p268_p3), [#allocation2], %s5140_s22 }
  0x30   : > { %5819 = dma.done.wait (%p5920_p7), %s274_s23, 2048  }
  0x31   : > { %5821 = vsyncadd (%p5920_p7), %s274_s23, 4294965248  ;;  %vm7411_vm0 = vcmask 261120   ;;  %v339_v0 = vld [vmem:[%s5970_s24] sm:$0xff]  ;;  %v341_v1 = vld [vmem:[%s5970_s24 + $0x10] sm:$0xff]  ;;  %s5843_s22 = smov 96   ;;  %s5141_s23 = sshll.u32 %s5132_s28, 4 }
  0x32   : > { %v340_v2 = vld [vmem:[%s5970_s24 + $0x8] sm:$0xff]  ;;  %v356_v3 = vsel %vm7411_vm0, %v339_v0, 0.0  ;;  %v362_v4 = vsel %vm7411_vm0, %v341_v1, 0.0  ;;  %v342_v5 = vld [vmem:[%s5970_s24 + $0x18] sm:$0xff]  ;;  %v343_v8 = vld [vmem:[%s5970_s24 + $0x20] sm:$0xff]  ;;  %p320_p7 = scmp.lt.s32.totalorder %s5141_s23, 31 }
  0x33   : > { %357 = vadd.xlane.f32.xlu0 %v356_v3  ;;  %363 = vadd.xlane.f32.xlu1 %v362_v4  ;;  %v359_v6 = vsel %vm7411_vm0, %v340_v2, 0.0  ;;  %v365_v7 = vsel %vm7411_vm0, %v342_v5, 0.0  ;;  %v344_v9 = vld [vmem:[%s5970_s24 + $0x28] sm:$0xff]  ;;  %v368_v10 = vsel %vm7411_vm0, %v343_v8, 0.0  ;;  %v5989_v12 = vld [vmem:[%s5970_s24 + $0x30] sm:$0xff]  ;;  %v5992_v13 = vld [vmem:[%s5970_s24 + $0x38] sm:$0xff] }
  0x34   : > { %v371_v11 = vsel %vm7411_vm0, %v344_v9, 0.0  ;;  %v374_v14 = vsel %vm7411_vm0, %v5989_v12, 0.0  ;;  %v377_v15 = vsel %vm7411_vm0, %v5992_v13, 0.0  ;;  %v5999_v16 = vld [vmem:[%s5970_s24 + $0x40] sm:$0xff]  ;;  %v6002_v17 = vld [vmem:[%s5970_s24 + $0x48] sm:$0xff]  ;;  %v6009_v20 = vld [vmem:[%s5970_s24 + $0x50] sm:$0xff] }
  0x35   : > { %v380_v18 = vsel %vm7411_vm0, %v5999_v16, 0.0  ;;  %v383_v19 = vsel %vm7411_vm0, %v6002_v17, 0.0  ;;  %v6012_v21 = vld [vmem:[%s5970_s24 + $0x58] sm:$0xff]  ;;  %v386_v22 = vsel %vm7411_vm0, %v6009_v20, 0.0  ;;  %v6019_v24 = vld [vmem:[%s5970_s24 + $0x60] sm:$0xff]  ;;  %v6022_v25 = vld [vmem:[%s5970_s24 + $0x68] sm:$0xff] }
  0x36   : > { %v389_v23 = vsel %vm7411_vm0, %v6012_v21, 0.0  ;;  %v392_v26 = vsel %vm7411_vm0, %v6019_v24, 0.0  ;;  %v395_v27 = vsel %vm7411_vm0, %v6022_v25, 0.0  ;;  %v6029_v28 = vld [vmem:[%s5970_s24 + $0x70] sm:$0xff]  ;;  %v6032_v29 = vld [vmem:[%s5970_s24 + $0x78] sm:$0xff]  ;;  %s7504_s23 = smov (!%p320_p7, %s5141_s23), 31 }
  0x37   : > { %360 = vadd.xlane.f32.xlu0 %v359_v6  ;;  %366 = vadd.xlane.f32.xlu1 %v365_v7  ;;  %v398_v30 = vsel %vm7411_vm0, %v6029_v28, 0.0  ;;  %v401_v31 = vsel %vm7411_vm0, %v6032_v29, 0.0  ;;  %s5142_s24 = sshll.u32 %s7504_s23, 1  ;;  %s5144_s27 = sshll.u32 %s7504_s23, 3 }
  0x38   : > { %s6551_s18 = scalar_lea.vmem %s7404_s1, %s5142_s24  ;;  %s6938_s20 = scalar_lea.vmem %s7410_s7, %s5144_s27 }
  0x39   : > { %s7273_s11 = scalar_lea.vmem %s7409_s6, %s5144_s27 }
  0x3b   : > { %369 = vadd.xlane.f32.xlu0 %v368_v10  ;;  %372 = vadd.xlane.f32.xlu1 %v371_v11 }
  0x3f   : > { %375 = vadd.xlane.f32.xlu0 %v374_v14  ;;  %378 = vadd.xlane.f32.xlu1 %v377_v15 }
  0x43   : > { %381 = vadd.xlane.f32.xlu0 %v380_v18  ;;  %384 = vadd.xlane.f32.xlu1 %v383_v19 }
  0x47   : > { %387 = vadd.xlane.f32.xlu0 %v386_v22  ;;  %390 = vadd.xlane.f32.xlu1 %v389_v23 }
  0x4b   : > { %393 = vadd.xlane.f32.xlu0 %v392_v26  ;;  %396 = vadd.xlane.f32.xlu1 %v395_v27 }
  0x4f   : > { %399 = vadd.xlane.f32.xlu0 %v398_v30  ;;  %402 = vadd.xlane.f32.xlu1 %v401_v31 }
  0xc0   : > { %v358_v32 = vpop.xlane.xlu0 %357  ;;  %v364_v33 = vpop.xlane.xlu1 %363 }
  0xc1   : > { %v405_v34 = vmul.f32 0.03125, %v358_v32  ;;  %v407_v35 = vmul.f32 0.03125, %v364_v33 }
  0xc3   : > { %v6038_v36 = vsub.f32 %v339_v0, %v405_v34  ;;  %v6040_v37 = vsub.f32 %v341_v1, %v407_v35 }
  0xc4   : > { %v361_v38 = vpop.xlane.xlu0 %360  ;;  %v367_v39 = vpop.xlane.xlu1 %366 }
  0xc5   : > { %v406_v40 = vmul.f32 0.03125, %v361_v38  ;;  %v408_v41 = vmul.f32 0.03125, %v367_v39  ;;  %v437_v42 = vmul.f32 %v6038_v36, %v6038_v36  ;;  %v439_v43 = vmul.f32 %v6040_v37, %v6040_v37 }
  0xc7   : > { %v6046_v44 = vsub.f32 %v340_v2, %v406_v40  ;;  %v6048_v45 = vsub.f32 %v342_v5, %v408_v41  ;;  %v453_v46 = vsel %vm7411_vm0, %v437_v42, 0.0  ;;  %v459_v51 = vsel %vm7411_vm0, %v439_v43, 0.0 }
  0xc8   : > { %454 = vadd.xlane.f32.xlu0 %v453_v46  ;;  %v370_v47 = vpop.xlane.xlu0 %369  ;;  %v373_v48 = vpop.xlane.xlu1 %372 }
  0xc9   : > { %v409_v49 = vmul.f32 0.03125, %v370_v47  ;;  %v410_v50 = vmul.f32 0.03125, %v373_v48  ;;  %v438_v52 = vmul.f32 %v6046_v44, %v6046_v44  ;;  %v440_v53 = vmul.f32 %v6048_v45, %v6048_v45 }
  0xcb   : > { %v6056_v54 = vsub.f32 %v343_v8, %v409_v49  ;;  %v6058_v55 = vsub.f32 %v344_v9, %v410_v50  ;;  %v456_v56 = vsel %vm7411_vm0, %v438_v52, 0.0  ;;  %v462_v61 = vsel %vm7411_vm0, %v440_v53, 0.0  ;;  %v724_v53 = vld [vmem:[%s7405_s2 + $0x8] sm:$0xff] }
  0xcc   : > { %460 = vadd.xlane.f32.xlu0 %v459_v51  ;;  %v376_v57 = vpop.xlane.xlu0 %375  ;;  %v379_v58 = vpop.xlane.xlu1 %378  ;;  %457 = vadd.xlane.f32.xlu1 %v456_v56 }
  0xcd   : > { %v411_v59 = vmul.f32 0.03125, %v376_v57  ;;  %v412_v60 = vmul.f32 0.03125, %v379_v58  ;;  %v441_v62 = vmul.f32 %v6056_v54, %v6056_v54  ;;  %v442_v63 = vmul.f32 %v6058_v55, %v6058_v55  ;;  %v725_v57 = vld [vmem:[%s7405_s2 + $0x10] sm:$0xff]  ;;  %v726_v58 = vld [vmem:[%s7405_s2 + $0x18] sm:$0xff] }
  0xcf   : > { %v6067_v0 = vsub.f32 %v5989_v12, %v411_v59  ;;  %v6070_v1 = vsub.f32 %v5992_v13, %v412_v60  ;;  %v465_v2 = vsel %vm7411_vm0, %v441_v62, 0.0  ;;  %v468_v7 = vsel %vm7411_vm0, %v442_v63, 0.0 }
  0xd0   : > { %v382_v3 = vpop.xlane.xlu0 %381  ;;  %v385_v4 = vpop.xlane.xlu1 %384  ;;  %463 = vadd.xlane.f32.xlu1 %v462_v61  ;;  %466 = vadd.xlane.f32.xlu0 %v465_v2  ;;  %v5499_v59 = vpack.c.bf16 %v726_v58, %v725_v57 }
  0xd1   : > { %v413_v5 = vmul.f32 0.03125, %v382_v3  ;;  %v414_v6 = vmul.f32 0.03125, %v385_v4  ;;  %v443_v8 = vmul.f32 %v6067_v0, %v6067_v0  ;;  %v444_v9 = vmul.f32 %v6070_v1, %v6070_v1 }
  0xd3   : > { %v6079_v10 = vsub.f32 %v5999_v16, %v413_v5  ;;  %v6082_v11 = vsub.f32 %v6002_v17, %v414_v6  ;;  %v471_v12 = vsel %vm7411_vm0, %v443_v8, 0.0  ;;  %v474_v19 = vsel %vm7411_vm0, %v444_v9, 0.0  ;;  %v6151_v9 = vld [vmem:[%s7407_s4] ss:$0 sm:$0xff] }
  0xd4   : > { %v388_v13 = vpop.xlane.xlu0 %387  ;;  %v391_v14 = vpop.xlane.xlu1 %390  ;;  %469 = vadd.xlane.f32.xlu1 %v468_v7  ;;  %472 = vadd.xlane.f32.xlu0 %v471_v12 }
  0xd5   : > { %v415_v15 = vmul.f32 0.03125, %v388_v13  ;;  %v416_v18 = vmul.f32 0.03125, %v391_v14  ;;  %v445_v22 = vmul.f32 %v6079_v10, %v6079_v10  ;;  %v446_v16 = vmul.f32 %v6082_v11, %v6082_v11 }
  0xd7   : > { %v6091_v23 = vsub.f32 %v6009_v20, %v415_v15  ;;  %v6094_v17 = vsub.f32 %v6012_v21, %v416_v18  ;;  %v477_v26 = vsel %vm7411_vm0, %v445_v22, 0.0  ;;  %v480_v33 = vsel %vm7411_vm0, %v446_v16, 0.0 }
  0xd8   : > { %v394_v27 = vpop.xlane.xlu0 %393  ;;  %v397_v30 = vpop.xlane.xlu1 %396  ;;  %475 = vadd.xlane.f32.xlu1 %v474_v19  ;;  %478 = vadd.xlane.f32.xlu0 %v477_v26  ;;  %v6160_v19 = vmul.f32 %v6151_v9, %v6040_v37  ;;  %v6164_v22 = vmul.f32 %v6151_v9, %v6046_v44  ;;  %v6169_v16 = vmul.f32 %v6151_v9, %v6038_v36 }
  0xd9   : > { %v417_v31 = vmul.f32 0.03125, %v394_v27  ;;  %v418_v32 = vmul.f32 0.03125, %v397_v30  ;;  %v447_v34 = vmul.f32 %v6091_v23, %v6091_v23  ;;  %v448_v20 = vmul.f32 %v6094_v17, %v6094_v17 }
  0xdb   : > { %v6103_v35 = vsub.f32 %v6019_v24, %v417_v31  ;;  %v6106_v21 = vsub.f32 %v6022_v25, %v418_v32  ;;  %v483_v38 = vsel %vm7411_vm0, %v447_v34, 0.0  ;;  %v486_v43 = vsel %vm7411_vm0, %v448_v20, 0.0 }
  0xdc   : > { %v400_v39 = vpop.xlane.xlu0 %399  ;;  %v403_v40 = vpop.xlane.xlu1 %402  ;;  %481 = vadd.xlane.f32.xlu1 %v480_v33  ;;  %484 = vadd.xlane.f32.xlu0 %v483_v38 }
  0xdd   : > { %v419_v41 = vmul.f32 0.03125, %v400_v39  ;;  %v420_v42 = vmul.f32 0.03125, %v403_v40  ;;  %v449_v46 = vmul.f32 %v6103_v35, %v6103_v35  ;;  %v450_v24 = vmul.f32 %v6106_v21, %v6106_v21 }
  0xdf   : > { %v6115_v47 = vsub.f32 %v6029_v28, %v419_v41  ;;  %v6118_v25 = vsub.f32 %v6032_v29, %v420_v42  ;;  %v489_v48 = vsel %vm7411_vm0, %v449_v46, 0.0  ;;  %v492_v50 = vsel %vm7411_vm0, %v450_v24, 0.0  ;;  %v723_v29 = vld [vmem:[%s7405_s2] sm:$0xff] }
  0xe0   : > { %487 = vadd.xlane.f32.xlu1 %v486_v43  ;;  %490 = vadd.xlane.f32.xlu0 %v489_v48  ;;  %v5495_v56 = vpack.c.bf16 %v724_v53, %v723_v29 }
  0xe1   : > { %v451_v49 = vmul.f32 %v6115_v47, %v6115_v47  ;;  %v452_v51 = vmul.f32 %v6118_v25, %v6118_v25 }
  0xe2   : > { %5496 = vmatprep.subr.bf16.mxu0 %v5495_v56 }
  0xe3   : > { %v495_v52 = vsel %vm7411_vm0, %v451_v49, 0.0  ;;  %v498_v28 = vsel %vm7411_vm0, %v452_v51, 0.0  ;;  %5498 = vmatpush3.bf16.msra.mxu0 %v5495_v56 }
  0xe4   : > { %493 = vadd.xlane.f32.xlu1 %v492_v50  ;;  %496 = vadd.xlane.f32.xlu0 %v495_v52 }
  0xe5   : > { %5500 = vmatprep.subr.bf16.mxu0 %v5499_v59 }
  0xe7   : > { %5502 = vmatpush3.bf16.msra.mxu0 %v5499_v59 }
  0xe8   : > { %499 = vadd.xlane.f32.xlu1 %v498_v28 }
 0x155   : > { %v455_v60 = vpop.xlane.xlu0 %454 }
 0x156   : > { %v501_v61 = vmul.f32 0.032258064, %v455_v60 }
 0x158   : > { %5548 = vrsqrt.f32 %v501_v61  ;;  %vm542_vm1 = vcmp.eq.f32.partialorder %v501_v61, inf  ;;  %vm544_vm3 = vcmp.eq.f32.partialorder %v501_v61, 0.0  ;;  %v545_v37 = vand.u32 2147483648, %v501_v61 }
 0x159   : > { %v461_v62 = vpop.xlane.xlu0 %460  ;;  %v458_v63 = vpop.xlane.xlu1 %457 }
 0x15a   : > { %v6140_v2 = vmul.f32 0.032258064, %v461_v62  ;;  %v502_v3 = vmul.f32 0.032258064, %v458_v63 }
 0x15c   : > { %5550 = vrsqrt.f32 %v6140_v2  ;;  %vm556_vm2 = vcmp.eq.f32.partialorder %v6140_v2, inf  ;;  %vm558_vm4 = vcmp.eq.f32.partialorder %v6140_v2, 0.0  ;;  %vm549_vm5 = vcmp.eq.f32.partialorder %v502_v3, inf }
 0x15d   : > { %5552 = vrsqrt.f32 %v502_v3  ;;  %v464_v4 = vpop.xlane.xlu1 %463  ;;  %v467_v5 = vpop.xlane.xlu0 %466  ;;  %vm551_vm6 = vcmp.eq.f32.partialorder %v502_v3, 0.0  ;;  %v559_v34 = vand.u32 2147483648, %v6140_v2  ;;  %v552_v20 = vand.u32 2147483648, %v502_v3 }
 0x15e   : > { %v6143_v6 = vmul.f32 0.032258064, %v464_v4  ;;  %v6145_v7 = vmul.f32 0.032258064, %v467_v5 }
 0x160   : > { %5554 = vrsqrt.f32 %v6143_v6  ;;  %vm563_vm7 = vcmp.eq.f32.partialorder %v6143_v6, inf  ;;  %v566_v41 = vand.u32 2147483648, %v6143_v6  ;;  %vm570_vm8 = vcmp.eq.f32.partialorder %v6145_v7, inf }
 0x161   : > { %5556 = vrsqrt.f32 %v6145_v7  ;;  %v470_v12 = vpop.xlane.xlu1 %469  ;;  %v473_v13 = vpop.xlane.xlu0 %472  ;;  %v573_v24 = vand.u32 2147483648, %v6145_v7  ;;  %vm565_vm12 = vcmp.eq.f32.partialorder %v6143_v6, 0.0  ;;  %vm572_vm13 = vcmp.eq.f32.partialorder %v6145_v7, 0.0 }
 0x162   : > { %v5549_v8 = vpop.eup %5548  ;;  %v6154_v15 = vmul.f32 0.032258064, %v470_v12  ;;  %v6156_v18 = vmul.f32 0.032258064, %v473_v13 }
 0x163   : > { %v541_v14 = vmul.f32 %v5549_v8, %v501_v61 }
 0x164   : > { %5558 = vrsqrt.f32 %v6154_v15  ;;  %vm577_vm9 = vcmp.eq.f32.partialorder %v6154_v15, inf  ;;  %v580_v51 = vand.u32 2147483648, %v6154_v15  ;;  %vm584_vm10 = vcmp.eq.f32.partialorder %v6156_v18, inf }
 0x165   : > { %5560 = vrsqrt.f32 %v6156_v18  ;;  %v476_v27 = vpop.xlane.xlu1 %475  ;;  %v479_v30 = vpop.xlane.xlu0 %478  ;;  %v543_v33 = vsel %vm542_vm1, %v501_v61, %v541_v14  ;;  %v587_v56 = vand.u32 2147483648, %v6156_v18  ;;  %vm586_vm15 = vcmp.eq.f32.partialorder %v6156_v18, 0.0 }
 0x166   : > { %v5551_v26 = vpop.eup %5550  ;;  %v6174_v44 = vmul.f32 0.032258064, %v476_v27  ;;  %v6176_v32 = vmul.f32 0.032258064, %v479_v30  ;;  %v546_v39 = vsel %vm544_vm3, %v545_v37, %v543_v33 }
 0x167   : > { %v5553_v31 = vpop.eup %5552  ;;  %v555_v38 = vmul.f32 %v5551_v26, %v6140_v2  ;;  %v652_v52 = vadd.f32 1e-06, %v546_v39 }
 0x168   : > { %v548_v36 = vmul.f32 %v5553_v31, %v502_v3  ;;  %5562 = vrsqrt.f32 %v6174_v44  ;;  %vm591_vm11 = vcmp.eq.f32.partialorder %v6174_v44, inf  ;;  %v594_v57 = vand.u32 2147483648, %v6174_v44 }
 0x169   : > { %5564 = vrsqrt.f32 %v6176_v32  ;;  %v482_v42 = vpop.xlane.xlu1 %481  ;;  %v485_v43 = vpop.xlane.xlu0 %484  ;;  %v557_v28 = vsel %vm556_vm2, %v6140_v2, %v555_v38  ;;  %vm598_vm14 = vcmp.eq.f32.partialorder %v6176_v32, inf  ;;  %v601_v62 = vand.u32 2147483648, %v6176_v32 }
 0x16a   : > { %v550_v40 = vsel %vm549_vm5, %v502_v3, %v548_v36  ;;  %v5555_v46 = vpop.eup %5554  ;;  %v6186_v48 = vmul.f32 0.032258064, %v482_v42  ;;  %v6188_v49 = vmul.f32 0.032258064, %v485_v43  ;;  %v560_v8 = vsel %vm558_vm4, %v559_v34, %v557_v28 }
 0x16b   : > { %v5557_v50 = vpop.eup %5556  ;;  %v562_v29 = vmul.f32 %v5555_v46, %v6143_v6  ;;  %v553_v53 = vsel %vm551_vm6, %v552_v20, %v550_v40  ;;  %vm579_vm2 = vcmp.eq.f32.partialorder %v6154_v15, 0.0  ;;  %vm593_vm3 = vcmp.eq.f32.partialorder %v6174_v44, 0.0 }
 0x16c   : > { %5566 = vrsqrt.f32 %v6186_v48  ;;  %v569_v61 = vmul.f32 %v5557_v50, %v6145_v7  ;;  %v653_v5 = vadd.f32 1e-06, %v553_v53  ;;  %vm605_vm1 = vcmp.eq.f32.partialorder %v6186_v48, inf }
 0x16d   : > { %5568 = vrsqrt.f32 %v6188_v49  ;;  %v488_v58 = vpop.xlane.xlu1 %487  ;;  %v491_v59 = vpop.xlane.xlu0 %490  ;;  %v564_v12 = vsel %vm563_vm7, %v6143_v6, %v562_v29  ;;  %v608_v26 = vand.u32 2147483648, %v6186_v48  ;;  %vm612_vm4 = vcmp.eq.f32.partialorder %v6188_v49, inf  ;;  %v6281_v6 = vld [vmem:[%s7408_s5] ss:$0 sm:$0xff] }
 0x16e   : > { %v5559_v60 = vpop.eup %5558  ;;  %v6208_v63 = vmul.f32 0.032258064, %v488_v58  ;;  %v6211_v4 = vmul.f32 0.032258064, %v491_v59  ;;  %5570 = vrcp.f32 %v652_v52  ;;  %v571_v37 = vsel %vm570_vm8, %v6145_v7, %v569_v61 }
 0x16f   : > { %v5561_v3 = vpop.eup %5560  ;;  %v576_v13 = vmul.f32 %v5559_v60, %v6154_v15  ;;  %vm600_vm5 = vcmp.eq.f32.partialorder %v6176_v32, 0.0  ;;  %v615_v31 = vand.u32 2147483648, %v6188_v49  ;;  %v654_v38 = vadd.f32 1e-06, %v560_v8 }
 0x170   : > { %5572 = vrsqrt.f32 %v6208_v63  ;;  %v583_v14 = vmul.f32 %v5561_v3, %v6156_v18  ;;  %vm619_vm6 = vcmp.eq.f32.partialorder %v6208_v63, inf  ;;  %v622_v42 = vand.u32 2147483648, %v6208_v63 }
 0x171   : > { %5574 = vrsqrt.f32 %v6211_v4  ;;  %v494_v2 = vpop.xlane.xlu1 %493  ;;  %v497_v27 = vpop.xlane.xlu0 %496  ;;  %v578_v39 = vsel %vm577_vm9, %v6154_v15, %v576_v13  ;;  %v629_v46 = vand.u32 2147483648, %v6211_v4  ;;  %vm621_vm9 = vcmp.eq.f32.partialorder %v6208_v63, 0.0 }
 0x172   : > { %v5563_v30 = vpop.eup %5562  ;;  %v6233_v33 = vmul.f32 0.032258064, %v494_v2  ;;  %v6236_v20 = vmul.f32 0.032258064, %v497_v27  ;;  %5576 = vrcp.f32 %v653_v5  ;;  %v585_v43 = vsel %vm584_vm10, %v6156_v18, %v583_v14 }
 0x173   : > { %v5565_v36 = vpop.eup %5564  ;;  %v590_v34 = vmul.f32 %v5563_v30, %v6174_v44  ;;  %vm628_vm8 = vcmp.eq.f32.partialorder %v6211_v4, 0.0  ;;  %v567_v60 = vsel %vm565_vm12, %v566_v41, %v564_v12  ;;  %v574_v61 = vsel %vm572_vm13, %v573_v24, %v571_v37 }
 0x174   : > { %v597_v40 = vmul.f32 %v5565_v36, %v6176_v32  ;;  %5578 = vrsqrt.f32 %v6233_v33  ;;  %vm633_vm7 = vcmp.eq.f32.partialorder %v6233_v33, inf  ;;  %v636_v29 = vand.u32 2147483648, %v6233_v33 }
 0x175   : > { %5580 = vrsqrt.f32 %v6236_v20  ;;  %v500_v50 = vpop.xlane.xlu1 %499  ;;  %v592_v28 = vsel %vm591_vm11, %v6174_v44, %v590_v34  ;;  %vm635_vm10 = vcmp.eq.f32.partialorder %v6233_v33, 0.0  ;;  %vm640_vm0 = vcmp.eq.f32.partialorder %v6236_v20, inf }
 0x176   : > { %v5567_v52 = vpop.eup %5566  ;;  %v6259_v53 = vmul.f32 0.032258064, %v500_v50  ;;  %5582 = vrcp.f32 %v654_v38  ;;  %v599_v3 = vsel %vm598_vm14, %v6176_v32, %v597_v40  ;;  %v643_v8 = vand.u32 2147483648, %v6236_v20 }
 0x177   : > { %v5569_v58 = vpop.eup %5568  ;;  %v604_v59 = vmul.f32 %v5567_v52, %v6186_v48  ;;  %vm642_vm11 = vcmp.eq.f32.partialorder %v6236_v20, 0.0  ;;  %v655_v12 = vadd.f32 1e-06, %v567_v60  ;;  %v656_v13 = vadd.f32 1e-06, %v574_v61 }
 0x178   : > { %v611_v5 = vmul.f32 %v5569_v58, %v6188_v49  ;;  %5584 = vrsqrt.f32 %v6259_v53  ;;  %v5571_v41 = vpop.eup %5570  ;;  %v650_v24 = vand.u32 2147483648, %v6259_v53  ;;  %vm647_vm12 = vcmp.eq.f32.partialorder %v6259_v53, inf }
 0x179   : > { %v606_v7 = vsel %vm605_vm1, %v6186_v48, %v604_v59  ;;  %v669_v27 = vmul.f32 %v5571_v41, %v6169_v16  ;;  %v581_v30 = vsel %vm579_vm2, %v580_v51, %v578_v39  ;;  %v588_v37 = vsel %vm586_vm15, %v587_v56, %v585_v43 }
 0x17a   : > { %v5573_v14 = vpop.eup %5572  ;;  %v613_v2 = vsel %vm612_vm4, %v6188_v49, %v611_v5  ;;  %vm649_vm13 = vcmp.eq.f32.partialorder %v6259_v53, 0.0  ;;  %5586 = vrcp.f32 %v655_v12  ;;  %v657_v38 = vadd.f32 1e-06, %v581_v30 }
 0x17b   : > { %v5575_v36 = vpop.eup %5574  ;;  %v618_v34 = vmul.f32 %v5573_v14, %v6208_v63  ;;  %v658_v40 = vadd.f32 1e-06, %v588_v37  ;;  %v707_v50 = vadd.f32 %v6281_v6, %v669_v27  ;;  %5588 = vrcp.f32 %v656_v13 }
 0x17c   : > { %v625_v16 = vmul.f32 %v5575_v36, %v6211_v4  ;;  %v595_v15 = vsel %vm593_vm3, %v594_v57, %v592_v28  ;;  %v5577_v18 = vpop.eup %5576  ;;  %5590 = vrcp.f32 %v657_v38  ;;  %v602_v39 = vsel %vm600_vm5, %v601_v62, %v599_v3 }
 0x17d   : > { %v620_v51 = vsel %vm619_vm6, %v6208_v63, %v618_v34  ;;  %v659_v56 = vadd.f32 1e-06, %v595_v15  ;;  %vm7415_vm14 = vcmp.eq.f32.partialorder %v6211_v4, inf  ;;  %vm7416_vm15 = vcmask 261120  }
 0x17e   : > { %v5579_v43 = vpop.eup %5578  ;;  %v627_v52 = vsel %vm7415_vm14, %v6211_v4, %v625_v16  ;;  %5311 = vmatprep.mubr.msk.f32.mxu0 %vm7416_vm15, %v707_v50  ;;  %v671_v44 = vmul.f32 %v5577_v18, %v6164_v22  ;;  %5592 = vrcp.f32 %v658_v40  ;;  %v660_v57 = vadd.f32 1e-06, %v602_v39  ;;  %vm7419_vm3 = vmmov %vm7416_vm15 }
 0x17f   : > { %v5581_v28 = vpop.eup %5580  ;;  %v632_v58 = vmul.f32 %v5579_v43, %v6233_v33  ;;  %5594 = vrcp.f32 %v659_v56  ;;  %vm7417_vm1 = vcmp.eq.f32.partialorder %v6186_v48, 0.0  ;;  %vm7418_vm2 = vcmp.eq.f32.partialorder %v6188_v49, 0.0 }
 0x180   : > { %v609_v32 = vsel %vm7417_vm1, %v608_v26, %v606_v7  ;;  %v616_v62 = vsel %vm7418_vm2, %v615_v31, %v613_v2  ;;  %v639_v59 = vmul.f32 %v5581_v28, %v6236_v20  ;;  %v708_v22 = vadd.f32 %v6281_v6, %v671_v44  ;;  %v5583_v61 = vpop.eup %5582 }
 0x181   : > { %5596 = vrcp.f32 %v660_v57  ;;  %v661_v60 = vadd.f32 1e-06, %v609_v32  ;;  %v634_v3 = vsel %vm633_vm7, %v6233_v33, %v632_v58  ;;  %v662_v5 = vadd.f32 1e-06, %v616_v62 }
 0x182   : > { %v623_v48 = vsel %vm621_vm9, %v622_v42, %v620_v51  ;;  %v630_v49 = vsel %vm628_vm8, %v629_v46, %v627_v52  ;;  %v5585_v26 = vpop.eup %5584  ;;  %v637_v31 = vsel %vm635_vm10, %v636_v29, %v634_v3  ;;  %v641_v41 = vsel %vm640_vm0, %v6236_v20, %v639_v59  ;;  %5312 = vmatmul.mubr.msk.f32.vlgmr.msra.gmra.mrb[0].mxu0 %vm7419_vm3, %v708_v22  ;;  %vm7420_vm0 = vmmov %vm7419_vm3 }
 0x183   : > { %v673_v63 = vmul.f32 %v5583_v61, %v6160_v19  ;;  %5598 = vrcp.f32 %v661_v60  ;;  %v646_v42 = vmul.f32 %v5585_v26, %v6259_v53  ;;  %v663_v4 = vadd.f32 1e-06, %v623_v48  ;;  %vm7421_vm4 = vmmov %vm7420_vm0 }
 0x184   : > { %5600 = vrcp.f32 %v662_v5  ;;  %v664_v46 = vadd.f32 1e-06, %v630_v49  ;;  %v527_v7 = vmul.f32 %v6151_v9, %v6048_v45  ;;  %v528_v33 = vmul.f32 %v6151_v9, %v6056_v54  ;;  %v5587_v19 = vpop.eup %5586  ;;  %vm7422_vm5 = vmmov %vm7420_vm0 }
 0x185   : > { %v709_v29 = vadd.f32 %v6281_v6, %v673_v63  ;;  %v644_v12 = vsel %vm642_vm11, %v643_v8, %v641_v41  ;;  %v529_v13 = vmul.f32 %v6151_v9, %v6058_v55  ;;  %v648_v14 = vsel %vm647_vm12, %v6259_v53, %v646_v42  ;;  %v5589_v2 = vpop.eup %5588  ;;  %vm7423_vm6 = vmmov %vm7420_vm0 }
 0x186   : > { %5602 = vrcp.f32 %v663_v4  ;;  %v665_v45 = vadd.f32 1e-06, %v637_v31  ;;  %v651_v54 = vsel %vm649_vm13, %v650_v24, %v648_v14  ;;  %v675_v20 = vmul.f32 %v5587_v19, %v527_v7  ;;  %v5591_v27 = vpop.eup %5590  ;;  %vm7424_vm7 = vmmov %vm7420_vm0 }
 0x187   : > { %5314 = vmatprep.mubr.msk.f32.mxu0 %vm7420_vm0, %v709_v29  ;;  %5604 = vrcp.f32 %v664_v46  ;;  %v666_v8 = vadd.f32 1e-06, %v644_v12  ;;  %v530_v55 = vmul.f32 %v6151_v9, %v6067_v0  ;;  %v677_v30 = vmul.f32 %v5589_v2, %v528_v33  ;;  %vm7425_vm8 = vmmov %vm7420_vm0 }
 0x188   : > { %v5593_v37 = vpop.eup %5592  ;;  %v531_v36 = vmul.f32 %v6151_v9, %v6070_v1  ;;  %v532_v34 = vmul.f32 %v6151_v9, %v6079_v10  ;;  %v710_v53 = vadd.f32 %v6281_v6, %v675_v20  ;;  %v679_v24 = vmul.f32 %v5591_v27, %v529_v13  ;;  %vm7426_vm9 = vmmov %vm7420_vm0 }
 0x189   : > { %v5595_v38 = vpop.eup %5594  ;;  %v711_v40 = vadd.f32 %v6281_v6, %v677_v30  ;;  %v681_v16 = vmul.f32 %v5593_v37, %v530_v55  ;;  %5606 = vrcp.f32 %v665_v45  ;;  %v667_v50 = vadd.f32 1e-06, %v651_v54  ;;  %vm7427_vm10 = vmmov %vm7420_vm0 }
 0x18a   : > { %5315 = vmatmul.mubr.msk.f32.gmra.mrb[2].mxu0 %vm7421_vm4, %v710_v53  ;;  %v712_v0 = vadd.f32 %v6281_v6, %v679_v24  ;;  %v683_v18 = vmul.f32 %v5595_v38, %v531_v36  ;;  %5608 = vrcp.f32 %v666_v8  ;;  %v533_v56 = vmul.f32 %v6151_v9, %v6082_v11  ;;  %vm7428_vm11 = vmmov %vm7420_vm0 }
 0x18b   : > { %v5597_v15 = vpop.eup %5596  ;;  %5317 = vmatprep.mubr.msk.f32.mxu0 %vm7422_vm5, %v711_v40  ;;  %v713_v1 = vadd.f32 %v6281_v6, %v681_v16  ;;  %v534_v43 = vmul.f32 %v6151_v9, %v6091_v23  ;;  %5610 = vrcp.f32 %v667_v50  ;;  %v535_v11 = vmul.f32 %v6151_v9, %v6094_v17  ;;  %vm7429_vm12 = vmmov %vm7420_vm0 }
 0x18c   : > { %v685_v10 = vmul.f32 %v5597_v15, %v532_v34  ;;  %v714_v52 = vadd.f32 %v6281_v6, %v683_v18  ;;  %v536_v62 = vmul.f32 %v6151_v9, %v6103_v35  ;;  %v537_v5 = vmul.f32 %v6151_v9, %v6106_v21  ;;  %vm7430_vm13 = vmmov %vm7420_vm0 }
 0x18d   : > { %v5599_v51 = vpop.eup %5598  ;;  %v538_v17 = vmul.f32 %v6151_v9, %v6115_v47  ;;  %v539_v41 = vmul.f32 %v6151_v9, %v6118_v25  ;;  %vm7431_vm14 = vmmov %vm7420_vm0  ;;  %v5841_v4 = vmov 0.0   ;;  %vm5842_vm2 = vmmov 0   ;;  %v5149_v25 = vld [vmem:[%s7406_s3] ss:$0 sm:$0xff] }
 0x18e   : > { %v5601_v39 = vpop.eup %5600  ;;  %5318 = vmatmul.mubr.msk.f32.gmra.mrb[4].mxu0 %vm7423_vm6, %v712_v0  ;;  %v687_v44 = vmul.f32 %v5599_v51, %v533_v56  ;;  %v715_v28 = vadd.f32 %v6281_v6, %v685_v10  ;;  %vm7432_vm15 = vmmov %vm7420_vm0  ;;  %5335 = vmatprep.subr.mxu1 %v5841_v4 }
 0x18f   : > { %5320 = vmatprep.mubr.msk.f32.mxu0 %vm7424_vm7, %v713_v1  ;;  %v689_v58 = vmul.f32 %v5601_v39, %v534_v43  ;;  %vm7433_vm1 = vmmov %vm7420_vm0  ;;  %5380 = vmatprep.subr.mxu0 %v5841_v4 }
 0x190   : > { %v5603_v57 = vpop.eup %5602  ;;  %v716_v23 = vadd.f32 %v6281_v6, %v687_v44  ;;  %5337 = vmatprep.mubr.msk.f32.mxu1 %vm5842_vm2, %v5841_v4  ;;  %vm7434_vm3 = vmmov %vm7420_vm0 }
 0x191   : > { %v5605_v32 = vpop.eup %5604  ;;  %v691_v59 = vmul.f32 %v5603_v57, %v535_v11  ;;  %v717_v60 = vadd.f32 %v6281_v6, %v689_v58  ;;  %vm7435_vm4 = vmmov %vm7420_vm0 }
 0x192   : > { %5321 = vmatmul.mubr.msk.f32.gmra.mrb[6].mxu0 %vm7425_vm8, %v714_v52  ;;  %v693_v61 = vmul.f32 %v5605_v32, %v536_v62  ;;  %vm7436_vm5 = vmmov %vm7420_vm0 }
 0x193   : > { %v5607_v22 = vpop.eup %5606  ;;  %5323 = vmatprep.mubr.msk.f32.mxu0 %vm7426_vm9, %v715_v28  ;;  %v718_v35 = vadd.f32 %v6281_v6, %v691_v59  ;;  %vm7437_vm6 = vmmov %vm7420_vm0 }
 0x194   : > { %v5609_v3 = vpop.eup %5608  ;;  %v695_v48 = vmul.f32 %v5607_v22, %v537_v5  ;;  %v719_v26 = vadd.f32 %v6281_v6, %v693_v61  ;;  %vm7438_vm7 = vmmov %vm7420_vm0  ;;  %v2159_v61 = vlaneseq }
 0x195   : > { %v5611_v49 = vpop.eup %5610  ;;  %v697_v31 = vmul.f32 %v5609_v3, %v538_v17  ;;  %vm7439_vm8 = vmmov %vm7420_vm0  ;;  %v2174_v3 = vld [vmem:[%s6551_s18] sm:$0x3]  ;;  %v2175_v17 = vld [vmem:[%s6551_s18 + $0x2] sm:$0x3] }
 0x196   : > { %5324 = vmatmul.mubr.msk.f32.gmra.mrb[8].mxu0 %vm7427_vm10, %v716_v23  ;;  %v720_v21 = vadd.f32 %v6281_v6, %v695_v48  ;;  %v699_v63 = vmul.f32 %v5611_v49, %v539_v41  ;;  %vm7440_vm9 = vmmov %vm7420_vm0  ;;  %v6554_v5 = vshrl.u32 %v2159_v61, 7  ;;  %v2176_v41 = vld [vmem:[%s6551_s18 + $0x4] sm:$0x3] }
 0x197   : > { %5326 = vmatprep.mubr.msk.f32.mxu0 %vm7428_vm11, %v717_v60  ;;  %v721_v47 = vadd.f32 %v6281_v6, %v697_v31  ;;  %vm7441_vm10 = vmmov %vm7420_vm0 }
 0x198   : > { %v722_v42 = vadd.f32 %v6281_v6, %v699_v63  ;;  %vm7442_vm11 = vmmov %vm7420_vm0  ;;  %v2163_v48 = vadd.s32 1, %v6554_v5  ;;  %v5198_v49 = vadd.s32 4294967295, %v6554_v5 }
 0x19a   : > { %5327 = vmatmul.mubr.msk.f32.gmra.mrb[10].mxu0 %vm7429_vm12, %v718_v35  ;;  %vm7443_vm12 = vmmov %vm7420_vm0  ;;  %v6557_v35 = vand.u32 127, %v2159_v61 }
 0x19b   : > { %5329 = vmatprep.mubr.msk.f32.mxu0 %vm7430_vm13, %v719_v26  ;;  %vm7444_vm13 = vmmov %vm7420_vm0  ;;  %v5844_v26 = vmov 0  }
 0x19e   : > { %5330 = vmatmul.mubr.msk.f32.gmra.mrb[12].mxu0 %vm7431_vm14, %v720_v21  ;;  %vm7445_vm14 = vmmov %vm7420_vm0 }
 0x19f   : > { %5332 = vmatprep.mubr.msk.f32.mxu0 %vm7432_vm15, %v721_v47  ;;  %vm7446_vm15 = vmmov %vm7420_vm0 }
 0x1a2   : > { %5333 = vmatmul.mubr.msk.f32.gmra.mrb[14].mxu0 %vm7433_vm1, %v722_v42  ;;  %vm7447_vm1 = vmmov %vm7420_vm0  ;;  %v2177_v42 = vld [vmem:[%s6551_s18 + $0x6] sm:$0x3] }
 0x1a3   : > { %5382 = vmatprep.mubr.msk.f32.mxu0 %vm5842_vm2, %v5841_v4 }
 0x255   : > { %v5313_v9 = vpop.f32.mrb[0].mxu0 }
 0x256   : > { %v854_v6 = vadd.f32 %v5313_v9, %v5149_v25  ;;  %v848_v46 = vpop.f32.mrb[1].mxu0 }
 0x257   : > { %v849_v7 = vadd.f32 %v5149_v25, %v848_v46  ;;  %v2178_v46 = vld [vmem:[%s6551_s18 + $0x8] sm:$0x3] }
 0x258   : > { %1005 = vrot.lane.b32.xlu1 %v854_v6, %s5843_s22 }
 0x259   : > { %928 = vrot.lane.b32.xlu0 %v849_v7, %s5843_s22  ;;  %5336 = vmatpush3.xpose.msk.msra.mxu1 %vm7434_vm3, %v849_v7  ;;  %vm7448_vm3 = vmmov %vm7420_vm0 }
 0x25a   : > { %5340 = vmatprep.subr.mxu1 %v5841_v4 }
 0x25d   : > { %v5316_v33 = vpop.f32.mrb[2].mxu0 }
 0x25e   : > { %v858_v29 = vpop.f32.mrb[3].mxu0  ;;  %v864_v14 = vadd.f32 %v5316_v33, %v5149_v25 }
 0x25f   : > { %v859_v12 = vadd.f32 %v5149_v25, %v858_v29 }
 0x261   : > { %1082 = vrot.lane.b32.xlu1 %v859_v12, %s5843_s22  ;;  %v5319_v19 = vpop.f32.mrb[4].mxu0 }
 0x262   : > { %v868_v13 = vpop.f32.mrb[5].mxu0  ;;  %v874_v20 = vadd.f32 %v5319_v19, %v5149_v25 }
 0x263   : > { %v869_v45 = vadd.f32 %v5149_v25, %v868_v13 }
 0x265   : > { %1159 = vrot.lane.b32.xlu1 %v864_v14, %s5843_s22  ;;  %1236 = vrot.lane.b32.xlu0 %v869_v45, %s5843_s22  ;;  %v5322_v2 = vpop.f32.mrb[6].mxu0 }
 0x266   : > { %v878_v54 = vpop.f32.mrb[7].mxu0  ;;  %v6436_v37 = vadd.f32 %v5322_v2, %v5149_v25 }
 0x267   : > { %v879_v8 = vadd.f32 %v5149_v25, %v878_v54 }
 0x269   : > { %1313 = vrot.lane.b32.xlu1 %v874_v20, %s5843_s22  ;;  %1390 = vrot.lane.b32.xlu0 %v879_v8, %s5843_s22  ;;  %v5325_v27 = vpop.f32.mrb[8].mxu0 }
 0x26a   : > { %v894_v55 = vadd.f32 %v5325_v27, %v5149_v25  ;;  %v888_v30 = vpop.f32.mrb[9].mxu0 }
 0x26b   : > { %v6438_v36 = vadd.f32 %v5149_v25, %v888_v30 }
 0x26c   : > { %5381 = vmatpush3.xpose.msk.msra.mxu0 %vm7420_vm0, %v894_v55 }
 0x26d   : > { %1467 = vrot.lane.b32.xlu1 %v6436_v37, %s5843_s22  ;;  %1544 = vrot.lane.b32.xlu0 %v6438_v36, %s5843_s22  ;;  %v5328_v34 = vpop.f32.mrb[10].mxu0 }
 0x26e   : > { %v898_v53 = vpop.f32.mrb[11].mxu0  ;;  %5390 = vmatprep.subr.mxu0 %v5841_v4  ;;  %v904_v16 = vadd.f32 %v5328_v34, %v5149_v25 }
 0x26f   : > { %v6446_v24 = vadd.f32 %v5149_v25, %v898_v53 }
 0x271   : > { %1621 = vrot.lane.b32.xlu1 %v894_v55, %s5843_s22  ;;  %1698 = vrot.lane.b32.xlu0 %v6446_v24, %s5843_s22  ;;  %v5331_v38 = vpop.f32.mrb[12].mxu0 }
 0x272   : > { %v908_v40 = vpop.f32.mrb[13].mxu0  ;;  %v914_v18 = vadd.f32 %v5331_v38, %v5149_v25 }
 0x273   : > { %v6451_v50 = vadd.f32 %v5149_v25, %v908_v40 }
 0x275   : > { %1775 = vrot.lane.b32.xlu1 %v904_v16, %s5843_s22  ;;  %1852 = vrot.lane.b32.xlu0 %v6451_v50, %s5843_s22  ;;  %v5334_v15 = vpop.f32.mrb[14].mxu0 }
 0x276   : > { %v918_v0 = vpop.f32.mrb[15].mxu0  ;;  %v924_v10 = vadd.f32 %v5334_v15, %v5149_v25 }
 0x277   : > { %v6456_v1 = vadd.f32 %v5149_v25, %v918_v0 }
 0x279   : > { %1929 = vrot.lane.b32.xlu1 %v914_v18, %s5843_s22  ;;  %2006 = vrot.lane.b32.xlu0 %v6456_v1, %s5843_s22 }
 0x27d   : > { %2083 = vrot.lane.b32.xlu1 %v924_v10, %s5843_s22 }
 0x2ca   : > { %v1006_v56 = vpop.permute.xlu1 %1005 }
 0x2cb   : > { %v929_v51 = vpop.permute.xlu0 %928 }
 0x2cc   : > { %5338 = vmatmul.mubr.msk.f32.vlgmr.msra.gmra.mrb[0].mxu1 %vm7435_vm4, %v929_v51  ;;  %vm7449_vm4 = vmmov %vm7420_vm0 }
 0x2cd   : > { %5341 = vmatpush3.xpose.msk.msra.mxu1 %vm7436_vm5, %v854_v6  ;;  %5342 = vmatprep.mubr.msk.f32.mxu1 %vm5842_vm2, %v5841_v4  ;;  %vm7450_vm5 = vmmov %vm7420_vm0 }
 0x2ce   : > { %5345 = vmatprep.subr.mxu1 %v5841_v4 }
 0x2d0   : > { %5343 = vmatmul.mubr.msk.f32.vlgmr.msra.gmra.mrb[2].mxu1 %vm7437_vm6, %v1006_v56  ;;  %vm7451_vm6 = vmmov %vm7420_vm0 }
 0x2d1   : > { %5346 = vmatpush3.xpose.msk.msra.mxu1 %vm7438_vm7, %v859_v12  ;;  %5347 = vmatprep.mubr.msk.f32.mxu1 %vm5842_vm2, %v5841_v4  ;;  %vm7452_vm7 = vmmov %vm7420_vm0 }
 0x2d2   : > { %5350 = vmatprep.subr.mxu1 %v5841_v4 }
 0x2d3   : > { %v1083_v39 = vpop.permute.xlu1 %1082 }
 0x2d4   : > { %5348 = vmatmul.mubr.msk.f32.vlgmr.msra.gmra.mrb[4].mxu1 %vm7439_vm8, %v1083_v39  ;;  %vm7453_vm8 = vmmov %vm7420_vm0  ;;  %v2183_v39 = vld [vmem:[%s6551_s18 + $0x12] sm:$0x3] }
 0x2d5   : > { %5351 = vmatpush3.xpose.msk.msra.mxu1 %vm7440_vm9, %v864_v14  ;;  %5352 = vmatprep.mubr.msk.f32.mxu1 %vm5842_vm2, %v5841_v4  ;;  %vm7454_vm9 = vmmov %vm7420_vm0 }
 0x2d6   : > { %5355 = vmatprep.subr.mxu1 %v5841_v4 }
 0x2d7   : > { %v1160_v43 = vpop.permute.xlu1 %1159  ;;  %v1237_v52 = vpop.permute.xlu0 %1236 }
 0x2d8   : > { %5353 = vmatmul.mubr.msk.f32.vlgmr.msra.gmra.mrb[6].mxu1 %vm7441_vm10, %v1160_v43  ;;  %vm7455_vm10 = vmmov %vm7420_vm0 }
 0x2d9   : > { %5356 = vmatpush3.xpose.msk.msra.mxu1 %vm7442_vm11, %v869_v45  ;;  %5357 = vmatprep.mubr.msk.f32.mxu1 %vm5842_vm2, %v5841_v4  ;;  %vm7456_vm11 = vmmov %vm7420_vm0  ;;  %v2179_v45 = vld [vmem:[%s6551_s18 + $0xa] sm:$0x3] }
 0x2da   : > { %5360 = vmatprep.subr.mxu1 %v5841_v4 }
 0x2db   : > { %v1314_v44 = vpop.permute.xlu1 %1313  ;;  %v1391_v28 = vpop.permute.xlu0 %1390 }
 0x2dc   : > { %5358 = vmatmul.mubr.msk.f32.vlgmr.msra.gmra.mrb[8].mxu1 %vm7443_vm12, %v1237_v52  ;;  %vm7457_vm12 = vmmov %vm7420_vm0 }
 0x2dd   : > { %5361 = vmatpush3.xpose.msk.msra.mxu1 %vm7444_vm13, %v874_v20  ;;  %5362 = vmatprep.mubr.msk.f32.mxu1 %vm5842_vm2, %v5841_v4  ;;  %vm7458_vm13 = vmmov %vm7420_vm0 }
 0x2de   : > { %5365 = vmatprep.subr.mxu1 %v5841_v4 }
 0x2df   : > { %v1468_v57 = vpop.permute.xlu1 %1467  ;;  %v1545_v32 = vpop.permute.xlu0 %1544 }
 0x2e0   : > { %5363 = vmatmul.mubr.msk.f32.vlgmr.msra.gmra.mrb[10].mxu1 %vm7445_vm14, %v1314_v44  ;;  %vm7459_vm14 = vmmov %vm7420_vm0 }
 0x2e1   : > { %5366 = vmatpush3.xpose.msk.msra.mxu1 %vm7446_vm15, %v879_v8  ;;  %5367 = vmatprep.mubr.msk.f32.mxu1 %vm5842_vm2, %v5841_v4  ;;  %vm7460_vm15 = vmmov %vm7420_vm0 }
 0x2e2   : > { %5370 = vmatprep.subr.mxu1 %v5841_v4 }
 0x2e3   : > { %v1622_v58 = vpop.permute.xlu1 %1621  ;;  %v1699_v23 = vpop.permute.xlu0 %1698 }
 0x2e4   : > { %5383 = vmatmul.mubr.msk.f32.vlgmr.msra.gmra.mrb[16].mxu0 %vm7447_vm1, %v1622_v58  ;;  %5368 = vmatmul.mubr.msk.f32.vlgmr.msra.gmra.mrb[12].mxu1 %vm7448_vm3, %v1391_v28  ;;  %vm7461_vm1 = vmmov %vm7420_vm0 }
 0x2e5   : > { %5391 = vmatpush3.xpose.msk.msra.mxu0 %vm7420_vm0, %v904_v16  ;;  %5392 = vmatprep.mubr.msk.f32.mxu0 %vm5842_vm2, %v5841_v4  ;;  %vm7462_vm3 = vmmov %vm7420_vm0 }
 0x2e6   : > { %5400 = vmatprep.subr.mxu0 %v5841_v4  ;;  %5371 = vmatpush3.xpose.msk.msra.mxu1 %vm7449_vm4, %v6436_v37  ;;  %vm2190_vm4 = vnez %v2174_v3  ;;  %v2180_v37 = vld [vmem:[%s6551_s18 + $0xc] sm:$0x3] }
 0x2e7   : > { %v1776_v11 = vpop.permute.xlu1 %1775  ;;  %5372 = vmatprep.mubr.msk.f32.mxu1 %vm5842_vm2, %v5841_v4  ;;  %5375 = vmatprep.subr.mxu1 %v5841_v4  ;;  %v1853_v22 = vpop.permute.xlu0 %1852  ;;  %v2208_v31 = vsel %vm2190_vm4, 16843009, %v5844_v26 }
 0x2e8   : > { %5393 = vmatmul.mubr.msk.f32.vlgmr.msra.gmra.mrb[18].mxu0 %vm7450_vm5, %v1776_v11  ;;  %vm2191_vm5 = vnez %v2175_v17  ;;  %v2224_v21 = vunpack.c.0.s8 %v2208_v31  ;;  %v2185_v11 = vld [vmem:[%s6551_s18 + $0x16] sm:$0x3] }
 0x2e9   : > { %5401 = vmatpush3.xpose.msk.msra.mxu0 %vm7451_vm6, %v914_v18  ;;  %5402 = vmatprep.mubr.msk.f32.mxu0 %vm5842_vm2, %v5841_v4  ;;  %vm2164_vm6 = vcmp.eq.s32.totalorder %v6557_v35, %v2163_v48  ;;  %v2209_v47 = vsel %vm2191_vm5, 16843009, %v5844_v26 }
 0x2ea   : > { %5410 = vmatprep.subr.mxu0 %v5841_v4  ;;  %5373 = vmatmul.mubr.msk.f32.vlgmr.msra.gmra.mrb[14].mxu1 %vm7452_vm7, %v1468_v57  ;;  %vm6565_vm7 = vcmp.eq.s32.totalorder %v6557_v35, %v5198_v49  ;;  %v2225_v9 = vunpack.c.0.s8 %v2209_v47  ;;  %v2182_v57 = vld [vmem:[%s6551_s18 + $0x10] sm:$0x3]  ;;  %v2187_v49 = vld [vmem:[%s6551_s18 + $0x1a] sm:$0x3] }
 0x2eb   : > { %v1930_v62 = vpop.permute.xlu1 %1929  ;;  %5376 = vmatpush3.xpose.msk.msra.mxu1 %vm7453_vm8, %v6438_v36  ;;  %5377 = vmatprep.mubr.msk.f32.mxu1 %vm5842_vm2, %v5841_v4  ;;  %v2007_v60 = vpop.permute.xlu0 %2006  ;;  %vm2192_vm8 = vnez %v2176_v41 }
 0x2ec   : > { %5403 = vmatmul.mubr.msk.f32.vlgmr.msra.gmra.mrb[20].mxu0 %vm7454_vm9, %v1930_v62  ;;  %5385 = vmatprep.subr.mxu1 %v5841_v4  ;;  %vm6573_vm9 = vmor %vm2164_vm6, %vm6565_vm7  ;;  %v2210_v6 = vsel %vm2192_vm8, 16843009, %v5844_v26  ;;  %vm2196_vm6 = vnez %v2180_v37 }
 0x2ed   : > { %5411 = vmatpush3.xpose.msk.msra.mxu0 %vm7455_vm10, %v924_v10  ;;  %5412 = vmatprep.mubr.msk.f32.mxu0 %vm5842_vm2, %v5841_v4  ;;  %vm2240_vm10 = vcmp.ne.s32.totalorder %v2224_v21, 0  ;;  %v2226_v33 = vunpack.c.0.s8 %v2210_v6  ;;  %v2214_v18 = vsel %vm2196_vm6, 16843009, %v5844_v26 }
 0x2ee   : > { %5378 = vmatmul.mubr.msk.f32.vlgmr.msra.gmra.mrb[16].mxu1 %vm7456_vm11, %v1545_v32  ;;  %5420 = vmatprep.subr.mxu0 %v5841_v4  ;;  %vm2193_vm11 = vnez %v2177_v42  ;;  %v2230_v52 = vunpack.c.0.s8 %v2214_v18 }
 0x2ef   : > { %v2084_v59 = vpop.permute.xlu1 %2083  ;;  %5386 = vmatpush3.xpose.msk.msra.mxu1 %vm7457_vm12, %v6446_v24  ;;  %5387 = vmatprep.mubr.msk.f32.mxu1 %vm5842_vm2, %v5841_v4  ;;  %vm2256_vm12 = vmand %vm6573_vm9, %vm2240_vm10  ;;  %v2211_v12 = vsel %vm2193_vm11, 16843009, %v5844_v26 }
 0x2f0   : > { %5413 = vmatmul.mubr.msk.f32.vlgmr.msra.gmra.mrb[22].mxu0 %vm7458_vm13, %v2084_v59  ;;  %5395 = vmatprep.subr.mxu1 %v5841_v4  ;;  %vm2288_vm13 = vcmask 64512   ;;  %v2227_v54 = vunpack.c.0.s8 %v2211_v12 }
 0x2f1   : > { %5422 = vmatprep.mubr.msk.f32.mxu0 %vm5842_vm2, %v5841_v4 }
 0x2f2   : > { %5388 = vmatmul.mubr.msk.f32.vlgmr.msra.gmra.mrb[18].mxu1 %vm7459_vm14, %v1699_v23  ;;  %vm6581_vm14 = vcmp.ne.s32.totalorder %v2225_v9, 0  ;;  %vm6609_vm5 = vcmp.ne.s32.totalorder %v2227_v54, 0  ;;  %v2186_v9 = vld [vmem:[%s6551_s18 + $0x18] sm:$0x3] }
 0x2f3   : > { %5396 = vmatpush3.xpose.msk.msra.mxu1 %vm7460_vm15, %v6451_v50  ;;  %5397 = vmatprep.mubr.msk.f32.mxu1 %vm5842_vm2, %v5841_v4  ;;  %vm2194_vm15 = vnez %v2178_v46  ;;  %vm2259_vm8 = vmand %vm6573_vm9, %vm6609_vm5 }
 0x2f4   : > { %5405 = vmatprep.subr.mxu1 %v5841_v4  ;;  %v2212_v8 = vsel %vm2194_vm15, 16843009, %v5844_v26  ;;  %vm2199_vm15 = vnez %v2183_v39 }
 0x2f5   : > { %v2228_v34 = vunpack.c.0.s8 %v2212_v8  ;;  %v2188_v8 = vld [vmem:[%s6551_s18 + $0x1c] sm:$0x3] }
 0x2f6   : > { %5398 = vmatmul.mubr.msk.f32.vlgmr.msra.gmra.mrb[20].mxu1 %vm7461_vm1, %v1853_v22  ;;  %vm2257_vm1 = vmand %vm6573_vm9, %vm6581_vm14  ;;  %v2217_v22 = vsel %vm2199_vm15, 16843009, %v5844_v26 }
 0x2f7   : > { %5406 = vmatpush3.xpose.msk.msra.mxu1 %vm7462_vm3, %v6456_v1  ;;  %5407 = vmatprep.mubr.msk.f32.mxu1 %vm5842_vm2, %v5841_v4  ;;  %vm6595_vm3 = vcmp.ne.s32.totalorder %v2226_v33, 0  ;;  %vm6622_vm10 = vcmp.ne.s32.totalorder %v2228_v34, 0  ;;  %v2181_v1 = vld [vmem:[%s6551_s18 + $0xe] sm:$0x3]  ;;  %v2233_v41 = vunpack.c.0.s8 %v2217_v22 }
 0x2f8   : > { %5415 = vmatprep.subr.mxu1 %v5841_v4  ;;  %vm2258_vm4 = vmand %vm6573_vm9, %vm6595_vm3  ;;  %vm2197_vm14 = vnez %v2181_v1  ;;  %vm6652_vm3 = vcmp.ne.s32.totalorder %v2230_v52, 0 }
 0x2f9   : > { %vm2260_vm11 = vmand %vm6573_vm9, %vm6622_vm10  ;;  %v2215_v62 = vsel %vm2197_vm14, 16843009, %v5844_v26  ;;  %vm2203_vm10 = vnez %v2187_v49 }
 0x2fa   : > { %5408 = vmatmul.mubr.msk.f32.vlgmr.msra.gmra.mrb[22].mxu1 %vm7420_vm0, %v2007_v60  ;;  %vm2195_vm0 = vnez %v2179_v45  ;;  %v2184_v60 = vld [vmem:[%s6551_s18 + $0x14] sm:$0x3]  ;;  %v2231_v17 = vunpack.c.0.s8 %v2215_v62  ;;  %vm2262_vm5 = vmand %vm6573_vm9, %vm6652_vm3 }
 0x2fb   : > { %5417 = vmatprep.mubr.msk.f32.mxu1 %vm5842_vm2, %v5841_v4  ;;  %v2213_v24 = vsel %vm2195_vm0, 16843009, %v5844_v26  ;;  %vm2198_vm0 = vnez %v2182_v57  ;;  %vm2200_vm6 = vnez %v2184_v60 }
 0x2fc   : > { %v2229_v15 = vunpack.c.0.s8 %v2213_v24  ;;  %v2216_v31 = vsel %vm2198_vm0, 16843009, %v5844_v26 }
 0x39f   : > { %v1000_v29 = vpop.f32.mrb[0].mxu1 }
 0x3a0   : > { %v6586_v19 = vsel %vm2256_vm12, %v1000_v29, -1e+09  ;;  %v5339_v13 = vpop.f32.mrb[1].mxu1  ;;  %vm6637_vm12 = vcmp.ne.s32.totalorder %v2229_v15, 0  ;;  %v2232_v29 = vunpack.c.0.s8 %v2216_v31 }
 0x3a1   : > { %v2289_v14 = vsel %vm2288_vm13, %v6586_v19, -inf  ;;  %v2189_v13 = vld [vmem:[%s6551_s18 + $0x1e] sm:$0x3] }
 0x3a2   : > { %2290 = vmax.xlane.f32.xlu0 %v2289_v14  ;;  %v2218_v14 = vsel %vm2200_vm6, 16843009, %v5844_v26  ;;  %vm6690_vm15 = vcmp.ne.s32.totalorder %v2232_v29, 0 }
 0x3a3   : > { %v1077_v20 = vpop.f32.mrb[2].mxu1  ;;  %v2234_v37 = vunpack.c.0.s8 %v2218_v14 }
 0x3a4   : > { %v6600_v27 = vsel %vm2257_vm1, %v1077_v20, -1e+09  ;;  %v5344_v55 = vpop.f32.mrb[3].mxu1  ;;  %vm2261_vm1 = vmand %vm6573_vm9, %vm6637_vm12  ;;  %vm2202_vm12 = vnez %v2186_v9  ;;  %v2221_v20 = vsel %vm2203_vm10, 16843009, %v5844_v26 }
 0x3a5   : > { %v2292_v30 = vsel %vm2288_vm13, %v6600_v27, -inf  ;;  %v2220_v34 = vsel %vm2202_vm12, 16843009, %v5844_v26  ;;  %vm6714_vm6 = vcmp.ne.s32.totalorder %v2234_v37, 0 }
 0x3a6   : > { %2293 = vmax.xlane.f32.xlu1 %v2292_v30 }
 0x3a7   : > { %v1154_v53 = vpop.f32.mrb[4].mxu1 }
 0x3a8   : > { %v6614_v38 = vsel %vm2258_vm4, %v1154_v53, -1e+09  ;;  %v5349_v40 = vpop.f32.mrb[5].mxu1  ;;  %vm2201_vm4 = vnez %v2185_v11 }
 0x3a9   : > { %v2295_v16 = vsel %vm2288_vm13, %v6614_v38, -inf  ;;  %v2219_v42 = vsel %vm2201_vm4, 16843009, %v5844_v26  ;;  %v2237_v40 = vunpack.c.0.s8 %v2221_v20  ;;  %vm2204_vm4 = vnez %v2188_v8 }
 0x3aa   : > { %2296 = vmax.xlane.f32.xlu0 %v2295_v16  ;;  %v2235_v2 = vunpack.c.0.s8 %v2219_v42  ;;  %v2222_v43 = vsel %vm2204_vm4, 16843009, %v5844_v26 }
 0x3ab   : > { %v1231_v0 = vpop.f32.mrb[6].mxu1  ;;  %vm6723_vm10 = vcmp.ne.s32.totalorder %v2237_v40, 0  ;;  %v2238_v22 = vunpack.c.0.s8 %v2222_v43 }
 0x3ac   : > { %v6628_v10 = vsel %vm2259_vm8, %v1231_v0, -1e+09  ;;  %v5354_v51 = vpop.f32.mrb[7].mxu1  ;;  %vm6672_vm8 = vcmp.ne.s32.totalorder %v2231_v17, 0  ;;  %vm6699_vm0 = vcmp.ne.s32.totalorder %v2235_v2, 0 }
 0x3ad   : > { %v2298_v56 = vsel %vm2288_vm13, %v6628_v10, -inf  ;;  %vm2263_vm14 = vmand %vm6573_vm9, %vm6672_vm8 }
 0x3ae   : > { %2299 = vmax.xlane.f32.xlu0 %v2298_v56  ;;  %v2236_v56 = vunpack.c.0.s8 %v2220_v34  ;;  %vm2267_vm8 = vmand %vm6573_vm9, %vm6699_vm0 }
 0x3af   : > { %v1308_v44 = vpop.f32.mrb[8].mxu1 }
 0x3b0   : > { %v6642_v28 = vsel %vm2260_vm11, %v1308_v44, -1e+09  ;;  %v5359_v58 = vpop.f32.mrb[9].mxu1  ;;  %vm6680_vm11 = vcmp.ne.s32.totalorder %v2233_v41, 0  ;;  %vm6739_vm12 = vcmp.ne.s32.totalorder %v2236_v56, 0 }
 0x3b1   : > { %v2301_v32 = vsel %vm2288_vm13, %v6642_v28, -inf  ;;  %vm2265_vm3 = vmand %vm6573_vm9, %vm6680_vm11 }
 0x3b2   : > { %2302 = vmax.xlane.f32.xlu0 %v2301_v32  ;;  %vm2266_vm11 = vmand %vm6573_vm9, %vm6714_vm6 }
 0x3b3   : > { %v1385_v59 = vpop.f32.mrb[10].mxu1 }
 0x3b4   : > { %v6658_v61 = vsel %vm2261_vm1, %v1385_v59, -1e+09  ;;  %v5364_v3 = vpop.f32.mrb[11].mxu1  ;;  %vm2205_vm1 = vnez %v2189_v13 }
 0x3b5   : > { %v2304_v48 = vsel %vm2288_vm13, %v6658_v61, -inf  ;;  %v2223_v0 = vsel %vm2205_vm1, 16843009, %v5844_v26  ;;  %vm2268_vm1 = vmand %vm6573_vm9, %vm6739_vm12 }
 0x3b6   : > { %2305 = vmax.xlane.f32.xlu1 %v2304_v48  ;;  %v2239_v57 = vunpack.c.0.s8 %v2223_v0 }
 0x3b7   : > { %v1693_v21 = vpop.f32.mrb[16].mxu0  ;;  %v1462_v47 = vpop.f32.mrb[12].mxu1 }
 0x3b8   : > { %v5384_v6 = vpop.f32.mrb[17].mxu0  ;;  %v6670_v46 = vsel %vm2262_vm5, %v1462_v47, -1e+09  ;;  %v5369_v7 = vpop.f32.mrb[13].mxu1  ;;  %vm2264_vm5 = vmand %vm6573_vm9, %vm6690_vm15  ;;  %v6712_v18 = vsel %vm2265_vm3, %v1693_v21, -1e+09 }
 0x3b9   : > { %v2307_v12 = vsel %vm2288_vm13, %v6670_v46, -inf  ;;  %v2316_v11 = vsel %vm2288_vm13, %v6712_v18, -inf  ;;  %vm6747_vm15 = vcmp.ne.s32.totalorder %v2239_v57, 0  ;;  %vm2254_vm3 = vcmp.ne.s32.totalorder %v2238_v22, 0 }
 0x3ba   : > { %2308 = vmax.xlane.f32.xlu0 %v2307_v12  ;;  %vm2271_vm0 = vmand %vm6573_vm9, %vm6747_vm15 }
 0x3bb   : > { %v1847_v54 = vpop.f32.mrb[18].mxu0  ;;  %vm2270_vm4 = vmand %vm6573_vm9, %vm2254_vm3 }
 0x3bc   : > { %v5394_v55 = vpop.f32.mrb[19].mxu0  ;;  %v6737_v26 = vsel %vm2267_vm8, %v1847_v54, -1e+09 }
 0x3bd   : > { %v1539_v36 = vpop.f32.mrb[14].mxu1  ;;  %v2322_v49 = vsel %vm2288_vm13, %v6737_v26, -inf }
 0x3be   : > { %v6703_v24 = vsel %vm2263_vm14, %v1539_v36, -1e+09  ;;  %v5374_v16 = vpop.f32.mrb[15].mxu1  ;;  %vm2269_vm14 = vmand %vm6573_vm9, %vm6723_vm10 }
 0x3bf   : > { %v2001_v50 = vpop.f32.mrb[20].mxu0  ;;  %v2310_v15 = vsel %vm2288_vm13, %v6703_v24, -inf }
 0x3c0   : > { %v5404_v1 = vpop.f32.mrb[21].mxu0  ;;  %2311 = vmax.xlane.f32.xlu1 %v2310_v15  ;;  %v6761_v41 = vsel %vm2269_vm14, %v2001_v50, -1e+09 }
 0x3c1   : > { %v1616_v39 = vpop.f32.mrb[16].mxu1  ;;  %v2328_v9 = vsel %vm2288_vm13, %v6761_v41, -inf }
 0x3c2   : > { %v6727_v44 = vsel %vm2264_vm5, %v1616_v39, -1e+09  ;;  %v5379_v58 = vpop.f32.mrb[17].mxu1 }
 0x3c3   : > { %v2155_v32 = vpop.f32.mrb[22].mxu0  ;;  %v2313_v62 = vsel %vm2288_vm13, %v6727_v44, -inf }
 0x3c4   : > { %v5414_v23 = vpop.f32.mrb[23].mxu0  ;;  %2317 = vmax.xlane.f32.xlu1 %v2316_v11  ;;  %2314 = vmax.xlane.f32.xlu0 %v2313_v62  ;;  %v6775_v7 = vsel %vm2271_vm0, %v2155_v32, -1e+09 }
 0x3c5   : > { %v1770_v60 = vpop.f32.mrb[18].mxu1  ;;  %v2334_v13 = vsel %vm2288_vm13, %v6775_v7, -inf }
 0x3c6   : > { %v6751_v17 = vsel %vm2266_vm11, %v1770_v60, -1e+09  ;;  %v5389_v48 = vpop.f32.mrb[19].mxu1 }
 0x3c7   : > { %v2319_v31 = vsel %vm2288_vm13, %v6751_v17, -inf }
 0x3c8   : > { %2323 = vmax.xlane.f32.xlu1 %v2322_v49  ;;  %2320 = vmax.xlane.f32.xlu0 %v2319_v31 }
 0x3c9   : > { %v1924_v21 = vpop.f32.mrb[20].mxu1 }
 0x3ca   : > { %v6767_v47 = vsel %vm2268_vm1, %v1924_v21, -1e+09  ;;  %v5399_v42 = vpop.f32.mrb[21].mxu1 }
 0x3cb   : > { %v2325_v6 = vsel %vm2288_vm13, %v6767_v47, -inf }
 0x3cc   : > { %2329 = vmax.xlane.f32.xlu1 %v2328_v9  ;;  %2326 = vmax.xlane.f32.xlu0 %v2325_v6 }
 0x3cd   : > { %v2078_v33 = vpop.f32.mrb[22].mxu1 }
 0x3ce   : > { %v6777_v29 = vsel %vm2270_vm4, %v2078_v33, -1e+09  ;;  %v5409_v12 = vpop.f32.mrb[23].mxu1 }
 0x3cf   : > { %v2331_v14 = vsel %vm2288_vm13, %v6777_v29, -inf }
 0x3d0   : > { %2335 = vmax.xlane.f32.xlu1 %v2334_v13  ;;  %2332 = vmax.xlane.f32.xlu0 %v2331_v14 }
 0x42f   : > { %v2291_v45 = vpop.xlane.xlu0 %2290 }
 0x430   : > { %v2337_v25 = vsub.f32 %v6586_v19, %v2291_v45 }
 0x432   : > { %v2353_v2 = vmul.f32 1.442695, %v2337_v25 }
 0x433   : > { %v2294_v54 = vpop.xlane.xlu1 %2293 }
 0x434   : > { %5612 = vpow2.f32 %v2353_v2  ;;  %v2338_v20 = vsub.f32 %v6600_v27, %v2294_v54 }
 0x436   : > { %v2355_v8 = vmul.f32 1.442695, %v2338_v20 }
 0x437   : > { %v2297_v55 = vpop.xlane.xlu0 %2296 }
 0x438   : > { %5614 = vpow2.f32 %v2355_v8  ;;  %v2339_v30 = vsub.f32 %v6614_v38, %v2297_v55 }
 0x43a   : > { %v2357_v37 = vmul.f32 1.442695, %v2339_v30 }
 0x43b   : > { %v2300_v36 = vpop.xlane.xlu0 %2299 }
 0x43c   : > { %5616 = vpow2.f32 %v2357_v37  ;;  %v2340_v34 = vsub.f32 %v6628_v10, %v2300_v36 }
 0x43e   : > { %v6787_v53 = vpop.eup %5612  ;;  %v2359_v40 = vmul.f32 1.442695, %v2340_v34 }
 0x43f   : > { %v2303_v16 = vpop.xlane.xlu0 %2302  ;;  %v2385_v19 = vsel %vm2288_vm13, %v6787_v53, 0.0 }
 0x440   : > { %5618 = vpow2.f32 %v2359_v40  ;;  %v2341_v27 = vsub.f32 %v6642_v28, %v2303_v16  ;;  %2386 = vadd.xlane.f32.xlu0 %v2385_v19 }
 0x442   : > { %v6792_v50 = vpop.eup %5614  ;;  %v2361_v15 = vmul.f32 1.442695, %v2341_v27 }
 0x443   : > { %v2388_v38 = vsel %vm2288_vm13, %v6792_v50, 0.0  ;;  %v2306_v56 = vpop.xlane.xlu1 %2305 }
 0x444   : > { %5620 = vpow2.f32 %v2361_v15  ;;  %2389 = vadd.xlane.f32.xlu1 %v2388_v38  ;;  %v2342_v32 = vsub.f32 %v6658_v61, %v2306_v56 }
 0x446   : > { %v6796_v10 = vpop.eup %5616  ;;  %v2363_v59 = vmul.f32 1.442695, %v2342_v32 }
 0x447   : > { %v2309_v0 = vpop.xlane.xlu0 %2308  ;;  %v2391_v1 = vsel %vm2288_vm13, %v6796_v10, 0.0 }
 0x448   : > { %v2343_v51 = vsub.f32 %v6670_v46, %v2309_v0  ;;  %2392 = vadd.xlane.f32.xlu0 %v2391_v1 }
 0x44a   : > { %v6801_v28 = vpop.eup %5618  ;;  %v2365_v39 = vmul.f32 1.442695, %v2343_v51 }
 0x44b   : > { %v2394_v43 = vsel %vm2288_vm13, %v6801_v28, 0.0 }
 0x44c   : > { %5622 = vpow2.f32 %v2365_v39  ;;  %2395 = vadd.xlane.f32.xlu1 %v2394_v43 }
 0x44d   : > { %v2312_v52 = vpop.xlane.xlu1 %2311 }
 0x44e   : > { %v6805_v57 = vpop.eup %5620  ;;  %v2344_v22 = vsub.f32 %v6703_v24, %v2312_v52 }
 0x44f   : > { %v2397_v58 = vsel %vm2288_vm13, %v6805_v57, 0.0 }
 0x450   : > { %2398 = vadd.xlane.f32.xlu0 %v2397_v58 }
 0x451   : > { %v2318_v46 = vpop.xlane.xlu1 %2317  ;;  %v2315_v11 = vpop.xlane.xlu0 %2314 }
 0x452   : > { %v2346_v62 = vsub.f32 %v6712_v18, %v2318_v46  ;;  %v2345_v23 = vsub.f32 %v6727_v44, %v2315_v11  ;;  %v2367_v18 = vmul.f32 1.442695, %v2344_v22 }
 0x454   : > { %v2371_v60 = vmul.f32 1.442695, %v2346_v62  ;;  %v2369_v3 = vmul.f32 1.442695, %v2345_v23 }
 0x455   : > { %v2324_v48 = vpop.xlane.xlu1 %2323  ;;  %v2321_v49 = vpop.xlane.xlu0 %2320 }
 0x456   : > { %v6813_v31 = vpop.eup %5622  ;;  %5624 = vpow2.f32 %v2371_v60  ;;  %v2347_v21 = vsub.f32 %v6751_v17, %v2321_v49  ;;  %v2348_v44 = vsub.f32 %v6737_v26, %v2324_v48 }
 0x457   : > { %5626 = vpow2.f32 %v2369_v3  ;;  %v2403_v61 = vsel %vm2288_vm13, %v6813_v31, 0.0 }
 0x458   : > { %5628 = vpow2.f32 %v2363_v59  ;;  %v2373_v42 = vmul.f32 1.442695, %v2347_v21  ;;  %2404 = vadd.xlane.f32.xlu0 %v2403_v61  ;;  %v2375_v33 = vmul.f32 1.442695, %v2348_v44 }
 0x459   : > { %v2330_v24 = vpop.xlane.xlu1 %2329  ;;  %v2327_v9 = vpop.xlane.xlu0 %2326 }
 0x45a   : > { %v2349_v6 = vsub.f32 %v6767_v47, %v2327_v9  ;;  %5630 = vpow2.f32 %v2373_v42  ;;  %v2350_v12 = vsub.f32 %v6761_v41, %v2330_v24 }
 0x45b   : > { %5632 = vpow2.f32 %v2367_v18 }
 0x45c   : > { %v2377_v17 = vmul.f32 1.442695, %v2349_v6  ;;  %v2379_v26 = vmul.f32 1.442695, %v2350_v12 }
 0x45d   : > { %v2336_v13 = vpop.xlane.xlu1 %2335  ;;  %v2333_v14 = vpop.xlane.xlu0 %2332 }
 0x45e   : > { %v2351_v45 = vsub.f32 %v6777_v29, %v2333_v14  ;;  %5634 = vpow2.f32 %v2377_v17  ;;  %v2352_v2 = vsub.f32 %v6775_v7, %v2336_v13 }
 0x45f   : > { %5636 = vpow2.f32 %v2375_v33 }
 0x460   : > { %v6822_v25 = vpop.eup %5624  ;;  %v2381_v54 = vmul.f32 1.442695, %v2351_v45  ;;  %v2383_v29 = vmul.f32 1.442695, %v2352_v2 }
 0x461   : > { %v6825_v20 = vpop.eup %5626  ;;  %v2412_v47 = vsel %vm2288_vm13, %v6822_v25, 0.0 }
 0x462   : > { %v6829_v8 = vpop.eup %5628  ;;  %2413 = vadd.xlane.f32.xlu1 %v2412_v47  ;;  %v2409_v41 = vsel %vm2288_vm13, %v6825_v20, 0.0  ;;  %5638 = vpow2.f32 %v2381_v54 }
 0x463   : > { %2410 = vadd.xlane.f32.xlu0 %v2409_v41  ;;  %5640 = vpow2.f32 %v2379_v26  ;;  %v2400_v7 = vsel %vm2288_vm13, %v6829_v8, 0.0 }
 0x464   : > { %v6833_v55 = vpop.eup %5630  ;;  %5642 = vpow2.f32 %v2383_v29 }
 0x465   : > { %v6837_v30 = vpop.eup %5632  ;;  %v2415_v37 = vsel %vm2288_vm13, %v6833_v55, 0.0 }
 0x466   : > { %2401 = vadd.xlane.f32.xlu1 %v2400_v7  ;;  %v2406_v34 = vsel %vm2288_vm13, %v6837_v30, 0.0 }
 0x467   : > { %2416 = vadd.xlane.f32.xlu0 %v2415_v37 }
 0x468   : > { %v6841_v36 = vpop.eup %5634 }
 0x469   : > { %v6845_v40 = vpop.eup %5636  ;;  %v2421_v16 = vsel %vm2288_vm13, %v6841_v36, 0.0 }
 0x46a   : > { %2407 = vadd.xlane.f32.xlu1 %v2406_v34  ;;  %v2418_v27 = vsel %vm2288_vm13, %v6845_v40, 0.0 }
 0x46b   : > { %2422 = vadd.xlane.f32.xlu0 %v2421_v16 }
 0x46c   : > { %v6849_v19 = vpop.eup %5638 }
 0x46d   : > { %v6853_v15 = vpop.eup %5640  ;;  %v2427_v38 = vsel %vm2288_vm13, %v6849_v19, 0.0 }
 0x46e   : > { %2419 = vadd.xlane.f32.xlu1 %v2418_v27  ;;  %v2424_v0 = vsel %vm2288_vm13, %v6853_v15, 0.0  ;;  %v6859_v1 = vpop.eup %5642 }
 0x46f   : > { %2428 = vadd.xlane.f32.xlu0 %v2427_v38  ;;  %v2430_v51 = vsel %vm2288_vm13, %v6859_v1, 0.0 }
 0x472   : > { %2425 = vadd.xlane.f32.xlu1 %v2424_v0 }
 0x476   : > { %2431 = vadd.xlane.f32.xlu1 %v2430_v51 }
 0x4cd   : > { %v2387_v56 = vpop.xlane.xlu0 %2386 }
 0x4ce   : > { %5644 = vrcp.f32 %v2387_v56 }
 0x4d1   : > { %v2390_v39 = vpop.xlane.xlu1 %2389 }
 0x4d2   : > { %5646 = vrcp.f32 %v2390_v39 }
 0x4d5   : > { %v2393_v43 = vpop.xlane.xlu0 %2392 }
 0x4d6   : > { %5648 = vrcp.f32 %v2393_v43 }
 0x4d8   : > { %v5645_v52 = vpop.eup %5644 }
 0x4d9   : > { %v2396_v58 = vpop.xlane.xlu1 %2395  ;;  %v6864_v32 = vmul.f32 %v5645_v52, %v6787_v53 }
 0x4da   : > { %5650 = vrcp.f32 %v2396_v58 }
 0x4db   : > { %2465 = vxpose.xlu0.b32.start.end [1/1] (short) (narrow) %v6864_v32, 8 }
 0x4dc   : > { %v5647_v46 = vpop.eup %5646 }
 0x4dd   : > { %v2399_v11 = vpop.xlane.xlu0 %2398  ;;  %v6868_v62 = vmul.f32 %v5647_v46, %v6792_v50 }
 0x4de   : > { %5652 = vrcp.f32 %v2399_v11 }
 0x4df   : > { %2497 = vxpose.xlu1.b32.start.end [1/1] (short) (narrow) %v6868_v62, 8 }
 0x4e0   : > { %v5649_v23 = vpop.eup %5648 }
 0x4e1   : > { %v6872_v59 = vmul.f32 %v5649_v23, %v6796_v10 }
 0x4e3   : > { %2529 = vxpose.xlu0.b32.start.end [1/1] (short) (narrow) %v6872_v59, 8 }
 0x4e4   : > { %v5651_v22 = vpop.eup %5650 }
 0x4e5   : > { %v2405_v53 = vpop.xlane.xlu0 %2404  ;;  %v6876_v60 = vmul.f32 %v5651_v22, %v6801_v28 }
 0x4e6   : > { %5654 = vrcp.f32 %v2405_v53 }
 0x4e7   : > { %2561 = vxpose.xlu0.b32.start.end [1/1] (short) (narrow) %v6876_v60, 8 }
 0x4e8   : > { %v5653_v3 = vpop.eup %5652 }
 0x4e9   : > { %v6880_v50 = vmul.f32 %v5653_v3, %v6805_v57 }
 0x4eb   : > { %2593 = vxpose.xlu1.b32.start.end [1/1] (short) (narrow) %v6880_v50, 8 }
 0x4ef   : > { %v2414_v48 = vpop.xlane.xlu1 %2413 }
 0x4f0   : > { %v5655_v49 = vpop.eup %5654  ;;  %5656 = vrcp.f32 %v2414_v48  ;;  %v2411_v10 = vpop.xlane.xlu0 %2410 }
 0x4f1   : > { %5658 = vrcp.f32 %v2411_v10  ;;  %v6884_v21 = vmul.f32 %v5655_v49, %v6813_v31 }
 0x4f3   : > { %v2402_v61 = vpop.xlane.xlu1 %2401  ;;  %2657 = vxpose.xlu1.b32.start.end [1/1] (short) (narrow) %v6884_v21, 8 }
 0x4f4   : > { %v2417_v28 = vpop.xlane.xlu0 %2416 }
 0x4f5   : > { %5660 = vrcp.f32 %v2417_v28 }
 0x4f7   : > { %v2408_v18 = vpop.xlane.xlu1 %2407 }
 0x4f8   : > { %v2423_v44 = vpop.xlane.xlu0 %2422 }
 0x4f9   : > { %5662 = vrcp.f32 %v2423_v44 }
 0x4fa   : > { %v5657_v57 = vpop.eup %5656 }
 0x4fb   : > { %v5659_v42 = vpop.eup %5658  ;;  %v2420_v24 = vpop.xlane.xlu1 %2419  ;;  %v6888_v9 = vmul.f32 %v5657_v57, %v6822_v25 }
 0x4fc   : > { %5664 = vrcp.f32 %v2420_v24  ;;  %v2429_v6 = vpop.xlane.xlu0 %2428  ;;  %v6891_v33 = vmul.f32 %v5659_v42, %v6825_v20 }
 0x4fd   : > { %5666 = vrcp.f32 %v2429_v6  ;;  %2753 = vxpose.xlu0.b32.start.end [1/1] (short) (narrow) %v6888_v9, 8 }
 0x4fe   : > { %5668 = vrcp.f32 %v2402_v61  ;;  %2721 = vxpose.xlu1.b32.start.end [1/1] (short) (narrow) %v6891_v33, 8 }
 0x4ff   : > { %v5661_v31 = vpop.eup %5660  ;;  %v2426_v12 = vpop.xlane.xlu1 %2425 }
 0x500   : > { %v6896_v17 = vmul.f32 %v5661_v31, %v6833_v55  ;;  %5670 = vrcp.f32 %v2426_v12 }
 0x502   : > { %2785 = vxpose.xlu1.b32.start.end [1/1] (short) (narrow) %v6896_v17, 8 }
 0x503   : > { %v5663_v13 = vpop.eup %5662  ;;  %v2432_v14 = vpop.xlane.xlu1 %2431 }
 0x504   : > { %v6900_v45 = vmul.f32 %v5663_v13, %v6841_v36  ;;  %5672 = vrcp.f32 %v2432_v14 }
 0x505   : > { %5674 = vrcp.f32 %v2408_v18 }
 0x506   : > { %v5665_v25 = vpop.eup %5664  ;;  %2849 = vxpose.xlu1.b32.start.end [1/1] (short) (narrow) %v6900_v45, 8 }
 0x507   : > { %v5667_v26 = vpop.eup %5666  ;;  %v6904_v2 = vmul.f32 %v5665_v25, %v6845_v40 }
 0x508   : > { %v5669_v54 = vpop.eup %5668  ;;  %v6907_v20 = vmul.f32 %v5667_v26, %v6849_v19 }
 0x509   : > { %2817 = vxpose.xlu0.b32.start.end [1/1] (short) (narrow) %v6904_v2, 8  ;;  %v6912_v47 = vmul.f32 %v5669_v54, %v6829_v8 }
 0x50a   : > { %2913 = vxpose.xlu1.b32.start.end [1/1] (short) (narrow) %v6907_v20, 8  ;;  %v5671_v41 = vpop.eup %5670 }
 0x50b   : > { %v6916_v29 = vmul.f32 %v5671_v41, %v6853_v15 }
 0x50d   : > { %2625 = vxpose.xlu0.b32.start.end [1/1] (short) (narrow) %v6912_v47, 8 }
 0x50e   : > { %v5673_v55 = vpop.eup %5672 }
 0x50f   : > { %v6920_v7 = vmul.f32 %v5673_v55, %v6859_v1  ;;  %v5675_v37 = vpop.eup %5674 }
 0x510   : > { %v6924_v36 = vmul.f32 %v5675_v37, %v6837_v30 }
 0x511   : > { %2881 = vxpose.xlu0.b32.start.end [1/1] (short) (narrow) %v6916_v29, 8 }
 0x515   : > { %2945 = vxpose.xlu0.b32.start.end [1/1] (short) (narrow) %v6920_v7, 8 }
 0x519   : > { %2689 = vxpose.xlu0.b32.start.end [1/1] (short) (narrow) %v6924_v36, 8 }
 0x55b   : > { %v2481_v8 = vpop.trf.xlu0 }
 0x55c   : > { %v2977_v34 = vmul.f32 %v2481_v8, %v6864_v32 }
 0x55e   : > { %v2993_v40 = vadd.f32 1e-09, %v2977_v34 }
 0x55f   : > { %v2513_v16 = vpop.trf.xlu1 }
 0x560   : > { %5676 = vrsqrt.f32 %v2993_v40  ;;  %v2978_v19 = vmul.f32 %v2513_v16, %v6868_v62  ;;  %vm3011_vm9 = vcmp.eq.f32.partialorder %v2993_v40, inf  ;;  %v3014_v58 = vand.u32 2147483648, %v2993_v40 }
 0x561   : > { %vm3013_vm5 = vcmp.eq.f32.partialorder %v2993_v40, 0.0 }
 0x562   : > { %v2994_v27 = vadd.f32 1e-09, %v2978_v19 }
 0x563   : > { %v2545_v15 = vpop.trf.xlu0 }
 0x564   : > { %5678 = vrsqrt.f32 %v2994_v27  ;;  %v2979_v38 = vmul.f32 %v2545_v15, %v6872_v59  ;;  %vm3018_vm6 = vcmp.eq.f32.partialorder %v2994_v27, inf  ;;  %v3021_v53 = vand.u32 2147483648, %v2994_v27 }
 0x565   : > { %vm3020_vm8 = vcmp.eq.f32.partialorder %v2994_v27, 0.0 }
 0x566   : > { %v2995_v0 = vadd.f32 1e-09, %v2979_v38 }
 0x567   : > { %v2577_v30 = vpop.trf.xlu0 }
 0x568   : > { %5680 = vrsqrt.f32 %v2995_v0  ;;  %v2980_v1 = vmul.f32 %v2577_v30, %v6876_v60  ;;  %vm3025_vm10 = vcmp.eq.f32.partialorder %v2995_v0, inf  ;;  %v3028_v18 = vand.u32 2147483648, %v2995_v0 }
 0x569   : > { %vm3027_vm11 = vcmp.eq.f32.partialorder %v2995_v0, 0.0 }
 0x56a   : > { %v5677_v51 = vpop.eup %5676  ;;  %v2996_v56 = vadd.f32 1e-09, %v2980_v1 }
 0x56b   : > { %v2609_v39 = vpop.trf.xlu1  ;;  %v3010_v43 = vmul.f32 %v5677_v51, %v2993_v40 }
 0x56c   : > { %5682 = vrsqrt.f32 %v2996_v56  ;;  %v2981_v52 = vmul.f32 %v2609_v39, %v6880_v50  ;;  %vm3032_vm12 = vcmp.eq.f32.partialorder %v2996_v56, inf  ;;  %v3035_v12 = vand.u32 2147483648, %v2996_v56 }
 0x56d   : > { %v3012_v32 = vsel %vm3011_vm9, %v2993_v40, %v3010_v43  ;;  %vm3034_vm14 = vcmp.eq.f32.partialorder %v2996_v56, 0.0 }
 0x56e   : > { %v5679_v46 = vpop.eup %5678  ;;  %v2997_v11 = vadd.f32 1e-09, %v2981_v52  ;;  %v6940_v62 = vsel %vm3013_vm5, %v3014_v58, %v3012_v32 }
 0x56f   : > { %v3123_v23 = vsel %vm6565_vm7, %v6940_v62, 0.0  ;;  %5003 = vst.msk [vmem:[%s6938_s20] sm:$0xff] %vm2288_vm13, %v6940_v62  ;;  %v3017_v59 = vmul.f32 %v5679_v46, %v2994_v27 }
 0x570   : > { %5684 = vrsqrt.f32 %v2997_v11  ;;  %v3139_v22 = vsel %vm2288_vm13, %v3123_v23, 0.0  ;;  %vm3039_vm15 = vcmp.eq.f32.partialorder %v2997_v11, inf  ;;  %v3042_v55 = vand.u32 2147483648, %v2997_v11 }
 0x571   : > { %3140 = vadd.xlane.f32.xlu1 %v3139_v22  ;;  %v3019_v60 = vsel %vm3018_vm6, %v2994_v27, %v3017_v59  ;;  %vm3041_vm1 = vcmp.eq.f32.partialorder %v2997_v11, 0.0 }
 0x572   : > { %v5681_v3 = vpop.eup %5680  ;;  %v6949_v50 = vsel %vm3020_vm8, %v3021_v53, %v3019_v60 }
 0x573   : > { %v2673_v48 = vpop.trf.xlu1  ;;  %v3124_v49 = vsel %vm6565_vm7, %v6949_v50, 0.0  ;;  %5004 = vst.msk [vmem:[%s6938_s20 + $0x8] sm:$0xff] %vm2288_vm13, %v6949_v50  ;;  %v3024_v10 = vmul.f32 %v5681_v3, %v2995_v0 }
 0x574   : > { %v2983_v61 = vmul.f32 %v2673_v48, %v6884_v21  ;;  %v3142_v28 = vsel %vm2288_vm13, %v3124_v49, 0.0 }
 0x575   : > { %3143 = vadd.xlane.f32.xlu0 %v3142_v28  ;;  %v3026_v44 = vsel %vm3025_vm10, %v2995_v0, %v3024_v10 }
 0x576   : > { %v5683_v57 = vpop.eup %5682  ;;  %v2999_v42 = vadd.f32 1e-09, %v2983_v61  ;;  %v6959_v24 = vsel %vm3027_vm11, %v3028_v18, %v3026_v44 }
 0x577   : > { %v3125_v6 = vsel %vm6565_vm7, %v6959_v24, 0.0  ;;  %5005 = vst.msk [vmem:[%s6938_s20 + $0x10] sm:$0xff] %vm2288_vm13, %v6959_v24  ;;  %v3031_v21 = vmul.f32 %v5683_v57, %v2996_v56 }
 0x578   : > { %5686 = vrsqrt.f32 %v2999_v42  ;;  %v3145_v31 = vsel %vm2288_vm13, %v3125_v6, 0.0  ;;  %vm3053_vm3 = vcmp.eq.f32.partialorder %v2999_v42, inf  ;;  %v3056_v51 = vand.u32 2147483648, %v2999_v42 }
 0x579   : > { %3146 = vadd.xlane.f32.xlu1 %v3145_v31  ;;  %v3033_v13 = vsel %vm3032_vm12, %v2996_v56, %v3031_v21  ;;  %vm3055_vm0 = vcmp.eq.f32.partialorder %v2999_v42, 0.0 }
 0x57a   : > { %v5685_v14 = vpop.eup %5684  ;;  %v6968_v25 = vsel %vm3034_vm14, %v3035_v12, %v3033_v13 }
 0x57b   : > { %v3126_v26 = vsel %vm6565_vm7, %v6968_v25, 0.0  ;;  %5006 = vst.msk [vmem:[%s6938_s20 + $0x18] sm:$0xff] %vm2288_vm13, %v6968_v25  ;;  %v3038_v54 = vmul.f32 %v5685_v14, %v2997_v11 }
 0x57c   : > { %v3148_v41 = vsel %vm2288_vm13, %v3126_v26, 0.0 }
 0x57d   : > { %v2769_v37 = vpop.trf.xlu0  ;;  %3149 = vadd.xlane.f32.xlu1 %v3148_v41  ;;  %v3040_v8 = vsel %vm3039_vm15, %v2997_v11, %v3038_v54 }
 0x57e   : > { %v2737_v34 = vpop.trf.xlu1  ;;  %v2986_v40 = vmul.f32 %v2769_v37, %v6888_v9  ;;  %v6978_v16 = vsel %vm3041_vm1, %v3042_v55, %v3040_v8 }
 0x57f   : > { %v2985_v19 = vmul.f32 %v2737_v34, %v6891_v33  ;;  %v3127_v27 = vsel %vm6565_vm7, %v6978_v16, 0.0  ;;  %5007 = vst.msk [vmem:[%s6938_s20 + $0x20] sm:$0xff] %vm2288_vm13, %v6978_v16 }
 0x580   : > { %v3002_v15 = vadd.f32 1e-09, %v2986_v40  ;;  %v3151_v38 = vsel %vm2288_vm13, %v3127_v27, 0.0 }
 0x581   : > { %v3001_v0 = vadd.f32 1e-09, %v2985_v19  ;;  %3152 = vadd.xlane.f32.xlu0 %v3151_v38 }
 0x582   : > { %v5687_v30 = vpop.eup %5686  ;;  %5688 = vrsqrt.f32 %v3002_v15  ;;  %v2801_v9 = vpop.trf.xlu1  ;;  %vm3074_vm4 = vcmp.eq.f32.partialorder %v3002_v15, inf  ;;  %vm3076_vm9 = vcmp.eq.f32.partialorder %v3002_v15, 0.0 }
 0x583   : > { %5690 = vrsqrt.f32 %v3001_v0  ;;  %v2987_v1 = vmul.f32 %v2801_v9, %v6896_v17  ;;  %v3052_v33 = vmul.f32 %v5687_v30, %v2999_v42  ;;  %vm3067_vm5 = vcmp.eq.f32.partialorder %v3001_v0, inf }
 0x584   : > { %vm3069_vm6 = vcmp.eq.f32.partialorder %v3001_v0, 0.0 }
 0x585   : > { %v3003_v56 = vadd.f32 1e-09, %v2987_v1  ;;  %v3054_v39 = vsel %vm3053_vm3, %v2999_v42, %v3052_v33 }
 0x586   : > { %v2865_v43 = vpop.trf.xlu1  ;;  %v6989_v52 = vsel %vm3055_vm0, %v3056_v51, %v3054_v39 }
 0x587   : > { %5692 = vrsqrt.f32 %v3003_v56  ;;  %v2989_v58 = vmul.f32 %v2865_v43, %v6900_v45  ;;  %v3129_v32 = vsel %vm6565_vm7, %v6989_v52, 0.0  ;;  %5009 = vst.msk [vmem:[%s6938_s20 + $0x30] sm:$0xff] %vm2288_vm13, %v6989_v52  ;;  %vm3081_vm8 = vcmp.eq.f32.partialorder %v3003_v56, inf }
 0x588   : > { %v3157_v17 = vsel %vm2288_vm13, %v3129_v32, 0.0  ;;  %v3084_v14 = vand.u32 2147483648, %v3003_v56  ;;  %vm3083_vm10 = vcmp.eq.f32.partialorder %v3003_v56, 0.0 }
 0x589   : > { %v6999_v46 = vadd.f32 1e-09, %v2989_v58  ;;  %v2833_v11 = vpop.trf.xlu0  ;;  %3158 = vadd.xlane.f32.xlu0 %v3157_v17 }
 0x58a   : > { %v2929_v23 = vpop.trf.xlu1  ;;  %v2988_v59 = vmul.f32 %v2833_v11, %v6904_v2  ;;  %v3070_v2 = vand.u32 2147483648, %v3001_v0 }
 0x58b   : > { %5694 = vrsqrt.f32 %v6999_v46  ;;  %v2991_v45 = vmul.f32 %v2929_v23, %v6907_v20  ;;  %v3077_v20 = vand.u32 2147483648, %v3002_v15  ;;  %vm3095_vm11 = vcmp.eq.f32.partialorder %v6999_v46, inf }
 0x58c   : > { %v5689_v22 = vpop.eup %5688  ;;  %v7004_v53 = vadd.f32 1e-09, %v2988_v59  ;;  %v3098_v19 = vand.u32 2147483648, %v6999_v46  ;;  %vm3097_vm12 = vcmp.eq.f32.partialorder %v6999_v46, 0.0 }
 0x58d   : > { %v5691_v60 = vpop.eup %5690  ;;  %v7006_v3 = vadd.f32 1e-09, %v2991_v45  ;;  %v2641_v48 = vpop.trf.xlu0  ;;  %v3073_v49 = vmul.f32 %v5689_v22, %v3002_v15 }
 0x58e   : > { %5696 = vrsqrt.f32 %v7004_v53  ;;  %v2982_v10 = vmul.f32 %v2641_v48, %v6912_v47  ;;  %v3066_v61 = vmul.f32 %v5691_v60, %v3001_v0  ;;  %vm3088_vm14 = vcmp.eq.f32.partialorder %v7004_v53, inf }
 0x58f   : > { %5698 = vrsqrt.f32 %v7006_v3  ;;  %v3075_v44 = vsel %vm3074_vm4, %v3002_v15, %v3073_v49  ;;  %vm3109_vm15 = vcmp.eq.f32.partialorder %v7006_v3, inf  ;;  %v3091_v1 = vand.u32 2147483648, %v7004_v53 }
 0x590   : > { %v7011_v28 = vadd.f32 1e-09, %v2982_v10  ;;  %v3068_v18 = vsel %vm3067_vm5, %v3001_v0, %v3066_v61  ;;  %v7015_v21 = vsel %vm3076_vm9, %v3077_v20, %v3075_v44  ;;  %v3112_v43 = vand.u32 2147483648, %v7006_v3 }
 0x591   : > { %v5693_v57 = vpop.eup %5692  ;;  %v2897_v42 = vpop.trf.xlu0  ;;  %v7013_v6 = vsel %vm3069_vm6, %v3070_v2, %v3068_v18  ;;  %5012 = vst.msk [vmem:[%s6938_s20 + $0x48] sm:$0xff] %vm2288_vm13, %v7015_v21  ;;  %vm3090_vm1 = vcmp.eq.f32.partialorder %v7004_v53, 0.0  ;;  %vm3111_vm3 = vcmp.eq.f32.partialorder %v7006_v3, 0.0 }
 0x592   : > { %5700 = vrsqrt.f32 %v7011_v28  ;;  %v2990_v47 = vmul.f32 %v2897_v42, %v6916_v29  ;;  %v3131_v31 = vsel %vm6565_vm7, %v7013_v6, 0.0  ;;  %5011 = vst.msk [vmem:[%s6938_s20 + $0x40] sm:$0xff] %vm2288_vm13, %v7013_v6  ;;  %v3080_v12 = vmul.f32 %v5693_v57, %v3003_v56 }
 0x593   : > { %v3163_v13 = vsel %vm2288_vm13, %v3131_v31, 0.0  ;;  %vm3046_vm0 = vcmp.eq.f32.partialorder %v7011_v28, inf  ;;  %v3049_v45 = vand.u32 2147483648, %v7011_v28  ;;  %vm3048_vm4 = vcmp.eq.f32.partialorder %v7011_v28, 0.0 }
 0x594   : > { %v7029_v26 = vadd.f32 1e-09, %v2990_v47  ;;  %3164 = vadd.xlane.f32.xlu0 %v3163_v13  ;;  %v3082_v29 = vsel %vm3081_vm8, %v3003_v56, %v3080_v12 }
 0x595   : > { %v5695_v54 = vpop.eup %5694  ;;  %v2961_v41 = vpop.trf.xlu0  ;;  %v7031_v55 = vsel %vm3083_vm10, %v3084_v14, %v3082_v29 }
 0x596   : > { %5702 = vrsqrt.f32 %v7029_v26  ;;  %v2992_v37 = vmul.f32 %v2961_v41, %v6920_v7  ;;  %v3133_v8 = vsel %vm6565_vm7, %v7031_v55, 0.0  ;;  %5013 = vst.msk [vmem:[%s6938_s20 + $0x50] sm:$0xff] %vm2288_vm13, %v7031_v55  ;;  %v3094_v34 = vmul.f32 %v5695_v54, %v6999_v46 }
 0x597   : > { %v3169_v40 = vsel %vm2288_vm13, %v3133_v8, 0.0  ;;  %vm3102_vm9 = vcmp.eq.f32.partialorder %v7029_v26, inf  ;;  %v3105_v61 = vand.u32 2147483648, %v7029_v26  ;;  %vm3104_vm5 = vcmp.eq.f32.partialorder %v7029_v26, 0.0 }
 0x598   : > { %v5697_v27 = vpop.eup %5696  ;;  %v3008_v15 = vadd.f32 1e-09, %v2992_v37  ;;  %3170 = vadd.xlane.f32.xlu0 %v3169_v40  ;;  %v3096_v7 = vsel %vm3095_vm11, %v6999_v46, %v3094_v34  ;;  %v3132_v54 = vsel %vm6565_vm7, %v7015_v21, 0.0 }
 0x599   : > { %v5699_v38 = vpop.eup %5698  ;;  %v2705_v0 = vpop.trf.xlu0  ;;  %v7048_v30 = vsel %vm3097_vm12, %v3098_v19, %v3096_v7  ;;  %v3087_v9 = vmul.f32 %v5697_v27, %v7004_v53  ;;  %v3166_v41 = vsel %vm2288_vm13, %v3132_v54, 0.0  ;;  %vm2169_vm12 = vcmp.ge.s32.totalorder %v6557_v35, 1 }
 0x59a   : > { %5704 = vrsqrt.f32 %v3008_v15  ;;  %v2984_v33 = vmul.f32 %v2705_v0, %v6924_v36  ;;  %v3135_v51 = vsel %vm6565_vm7, %v7048_v30, 0.0  ;;  %5015 = vst.msk [vmem:[%s6938_s20 + $0x60] sm:$0xff] %vm2288_vm13, %v7048_v30  ;;  %v3108_v56 = vmul.f32 %v5699_v38, %v7006_v3 }
 0x59b   : > { %v3175_v39 = vsel %vm2288_vm13, %v3135_v51, 0.0  ;;  %v3089_v58 = vsel %vm3088_vm14, %v7004_v53, %v3087_v9  ;;  %vm3116_vm6 = vcmp.eq.f32.partialorder %v3008_v15, inf  ;;  %v3119_v44 = vand.u32 2147483648, %v3008_v15 }
 0x59c   : > { %v5701_v36 = vpop.eup %5700  ;;  %v3000_v32 = vadd.f32 1e-09, %v2984_v33  ;;  %3176 = vadd.xlane.f32.xlu0 %v3175_v39  ;;  %v3110_v17 = vsel %vm3109_vm15, %v7006_v3, %v3108_v56  ;;  %v7067_v46 = vsel %vm3090_vm1, %v3091_v1, %v3089_v58  ;;  %vm3118_vm8 = vcmp.eq.f32.partialorder %v3008_v15, 0.0 }
 0x59d   : > { %v7069_v11 = vsel %vm3111_vm3, %v3112_v43, %v3110_v17  ;;  %v3045_v23 = vmul.f32 %v5701_v36, %v7011_v28  ;;  %5014 = vst.msk [vmem:[%s6938_s20 + $0x58] sm:$0xff] %vm2288_vm13, %v7067_v46  ;;  %v3134_v37 = vsel %vm6565_vm7, %v7067_v46, 0.0  ;;  %vm2170_vm14 = vcmp.le.s32.totalorder %v6557_v35, %v6554_v5 }
 0x59e   : > { %5706 = vrsqrt.f32 %v3000_v32  ;;  %v3137_v59 = vsel %vm6565_vm7, %v7069_v11, 0.0  ;;  %5017 = vst.msk [vmem:[%s6938_s20 + $0x70] sm:$0xff] %vm2288_vm13, %v7069_v11  ;;  %vm3060_vm10 = vcmp.eq.f32.partialorder %v3000_v32, inf  ;;  %v3063_v12 = vand.u32 2147483648, %v3000_v32  ;;  %vm2171_vm15 = vmand %vm2169_vm12, %vm2170_vm14 }
 0x59f   : > { %v3181_v22 = vsel %vm2288_vm13, %v3137_v59, 0.0  ;;  %v3047_v53 = vsel %vm3046_vm0, %v7011_v28, %v3045_v23  ;;  %vm3062_vm11 = vcmp.eq.f32.partialorder %v3000_v32, 0.0  ;;  %v3172_v8 = vsel %vm2288_vm13, %v3134_v37, 0.0 }
 0x5a0   : > { %v5703_v60 = vpop.eup %5702  ;;  %3182 = vadd.xlane.f32.xlu0 %v3181_v22  ;;  %v7086_v3 = vsel %vm3048_vm4, %v3049_v45, %v3047_v53  ;;  %v7139_v39 = vsel %vm2171_vm15, 1.0, %v5841_v4 }
 0x5a1   : > { %v3128_v48 = vsel %vm6565_vm7, %v7086_v3, 0.0  ;;  %5008 = vst.msk [vmem:[%s6938_s20 + $0x28] sm:$0xff] %vm2288_vm13, %v7086_v3  ;;  %v3101_v49 = vmul.f32 %v5703_v60, %v7029_v26 }
 0x5a2   : > { %v3154_v10 = vsel %vm2288_vm13, %v3128_v48, 0.0 }
 0x5a3   : > { %3155 = vadd.xlane.f32.xlu1 %v3154_v10  ;;  %v3103_v2 = vsel %vm3102_vm9, %v7029_v26, %v3101_v49 }
 0x5a4   : > { %v5705_v20 = vpop.eup %5704  ;;  %v7100_v28 = vsel %vm3104_vm5, %v3105_v61, %v3103_v2 }
 0x5a5   : > { %5016 = vst.msk [vmem:[%s6938_s20 + $0x68] sm:$0xff] %vm2288_vm13, %v7100_v28  ;;  %v3115_v18 = vmul.f32 %v5705_v20, %v3008_v15  ;;  %v3136_v34 = vsel %vm6565_vm7, %v7100_v28, 0.0 }
 0x5a6   : > { %v3178_v40 = vsel %vm2288_vm13, %v3136_v34, 0.0 }
 0x5a7   : > { %v3117_v57 = vsel %vm3116_vm6, %v3008_v15, %v3115_v18 }
 0x5a8   : > { %v5707_v42 = vpop.eup %5706  ;;  %v7105_v47 = vsel %vm3118_vm8, %v3119_v44, %v3117_v57 }
 0x5a9   : > { %v3059_v31 = vmul.f32 %v5707_v42, %v3000_v32  ;;  %5018 = vst.msk [vmem:[%s6938_s20 + $0x78] sm:$0xff] %vm2288_vm13, %v7105_v47  ;;  %v3138_v19 = vsel %vm6565_vm7, %v7105_v47, 0.0 }
 0x5aa   : > { %v3184_v27 = vsel %vm2288_vm13, %v3138_v19, 0.0 }
 0x5ab   : > { %v3061_v13 = vsel %vm3060_vm10, %v3000_v32, %v3059_v31 }
 0x5ac   : > { %v7110_v14 = vsel %vm3062_vm11, %v3063_v12, %v3061_v13 }
 0x5ad   : > { %v3130_v26 = vsel %vm6565_vm7, %v7110_v14, 0.0  ;;  %5010 = vst.msk [vmem:[%s6938_s20 + $0x38] sm:$0xff] %vm2288_vm13, %v7110_v14  ;;  %vm7264_vm7 = vcmp.eq.s32.totalorder %v6557_v35, %v6554_v5 }
 0x5ae   : > { %v3160_v29 = vsel %vm2288_vm13, %v3130_v26, 0.0 }
 0x5af   : > { %3161 = vadd.xlane.f32.xlu1 %v3160_v29 }
 0x5b3   : > { %3167 = vadd.xlane.f32.xlu1 %v3166_v41 }
 0x5b7   : > { %3173 = vadd.xlane.f32.xlu1 %v3172_v8 }
 0x5bb   : > { %3179 = vadd.xlane.f32.xlu1 %v3178_v40 }
 0x5bf   : > { %3185 = vadd.xlane.f32.xlu1 %v3184_v27 }
 0x5fe   : > { %v3141_v15 = vpop.xlane.xlu1 %3140 }
 0x5ff   : > { %v3187_v7 = vadd.f32 1e-09, %v3141_v15 }
 0x601   : > { %5708 = vlog2.f32 %v3187_v7 }
 0x602   : > { %v3144_v38 = vpop.xlane.xlu0 %3143 }
 0x603   : > { %v3188_v0 = vadd.f32 1e-09, %v3144_v38 }
 0x605   : > { %5710 = vlog2.f32 %v3188_v0 }
 0x606   : > { %v3147_v9 = vpop.xlane.xlu1 %3146 }
 0x607   : > { %v3189_v1 = vadd.f32 1e-09, %v3147_v9 }
 0x609   : > { %5712 = vlog2.f32 %v3189_v1 }
 0x60a   : > { %v3150_v63 = vpop.xlane.xlu1 %3149 }
 0x60b   : > { %v5709_v33 = vpop.eup %5708  ;;  %v3190_v51 = vadd.f32 1e-09, %v3150_v63 }
 0x60c   : > { %v3204_v56 = vmul.f32 0.6931472, %v5709_v33 }
 0x60d   : > { %5714 = vlog2.f32 %v3190_v51 }
 0x60e   : > { %5416 = vmatpush3.msra.mxu1 %v3204_v56  ;;  %v3153_v43 = vpop.xlane.xlu0 %3152 }
 0x60f   : > { %v5711_v58 = vpop.eup %5710  ;;  %v3191_v36 = vadd.f32 1e-09, %v3153_v43  ;;  %5418 = vmatmul.mubr.msk.f32.vlgmr.msra.gmra.mrb[24].mxu1 %vm2288_vm13, %v7139_v39  ;;  %5425 = vmatprep.subr.mxu1 %v5841_v4 }
 0x610   : > { %v3206_v32 = vmul.f32 0.6931472, %v5711_v58  ;;  %5427 = vmatprep.mubr.msk.f32.mxu1 %vm5842_vm2, %v5841_v4 }
 0x611   : > { %5716 = vlog2.f32 %v3191_v36 }
 0x612   : > { %5421 = vmatpush3.msra.mxu0 %v3206_v32 }
 0x613   : > { %v5713_v17 = vpop.eup %5712  ;;  %5423 = vmatmul.mubr.msk.f32.vlgmr.msra.gmra.mrb[24].mxu0 %vm2288_vm13, %v7139_v39  ;;  %5430 = vmatprep.subr.mxu0 %v5841_v4 }
 0x614   : > { %v3208_v23 = vmul.f32 0.6931472, %v5713_v17  ;;  %5432 = vmatprep.mubr.msk.f32.mxu0 %vm5842_vm2, %v5841_v4 }
 0x616   : > { %5426 = vmatpush3.msra.mxu1 %v3208_v23  ;;  %v3159_v59 = vpop.xlane.xlu0 %3158 }
 0x617   : > { %v5715_v45 = vpop.eup %5714  ;;  %v3193_v22 = vadd.f32 1e-09, %v3159_v59  ;;  %5428 = vmatmul.mubr.msk.f32.vlgmr.msra.gmra.mrb[26].mxu1 %vm2288_vm13, %v7139_v39  ;;  %5435 = vmatprep.subr.mxu1 %v5841_v4 }
 0x618   : > { %v3210_v53 = vmul.f32 0.6931472, %v5715_v45  ;;  %5437 = vmatprep.mubr.msk.f32.mxu1 %vm5842_vm2, %v5841_v4 }
 0x619   : > { %5718 = vlog2.f32 %v3193_v22 }
 0x61a   : > { %5431 = vmatpush3.msra.mxu0 %v3210_v53 }
 0x61b   : > { %v5717_v60 = vpop.eup %5716  ;;  %5433 = vmatmul.mubr.msk.f32.vlgmr.msra.gmra.mrb[26].mxu0 %vm2288_vm13, %v7139_v39  ;;  %5440 = vmatprep.subr.mxu0 %v5841_v4 }
 0x61c   : > { %v3212_v48 = vmul.f32 0.6931472, %v5717_v60  ;;  %5442 = vmatprep.mubr.msk.f32.mxu0 %vm5842_vm2, %v5841_v4 }
 0x61e   : > { %5436 = vmatpush3.msra.mxu1 %v3212_v48 }
 0x61f   : > { %5438 = vmatmul.mubr.msk.f32.vlgmr.msra.gmra.mrb[28].mxu1 %vm2288_vm13, %v7139_v39  ;;  %5445 = vmatprep.subr.mxu1 %v5841_v4 }
 0x620   : > { %5447 = vmatprep.mubr.msk.f32.mxu1 %vm5842_vm2, %v5841_v4 }
 0x621   : > { %v3165_v49 = vpop.xlane.xlu0 %3164 }
 0x622   : > { %v3195_v10 = vadd.f32 1e-09, %v3165_v49 }
 0x623   : > { %v5719_v61 = vpop.eup %5718 }
 0x624   : > { %v3216_v2 = vmul.f32 0.6931472, %v5719_v61  ;;  %5720 = vlog2.f32 %v3195_v10 }
 0x625   : > { %v3171_v20 = vpop.xlane.xlu0 %3170 }
 0x626   : > { %v3197_v18 = vadd.f32 1e-09, %v3171_v20  ;;  %5446 = vmatpush3.msra.mxu1 %v3216_v2 }
 0x627   : > { %5448 = vmatmul.mubr.msk.f32.vlgmr.msra.gmra.mrb[30].mxu1 %vm2288_vm13, %v7139_v39  ;;  %5455 = vmatprep.subr.mxu1 %v5841_v4 }
 0x628   : > { %5722 = vlog2.f32 %v3197_v18  ;;  %5457 = vmatprep.mubr.msk.f32.mxu1 %vm5842_vm2, %v5841_v4 }
 0x629   : > { %v3177_v44 = vpop.xlane.xlu0 %3176 }
 0x62a   : > { %v3199_v57 = vadd.f32 1e-09, %v3177_v44 }
 0x62c   : > { %5724 = vlog2.f32 %v3199_v57 }
 0x62d   : > { %v3183_v42 = vpop.xlane.xlu0 %3182 }
 0x62e   : > { %v5721_v31 = vpop.eup %5720  ;;  %v3201_v12 = vadd.f32 1e-09, %v3183_v42 }
 0x62f   : > { %v3220_v13 = vmul.f32 0.6931472, %v5721_v31 }
 0x630   : > { %5726 = vlog2.f32 %v3201_v12  ;;  %v3156_v26 = vpop.xlane.xlu1 %3155 }
 0x631   : > { %v3192_v29 = vadd.f32 1e-09, %v3156_v26  ;;  %5456 = vmatpush3.msra.mxu1 %v3220_v13 }
 0x632   : > { %v5723_v54 = vpop.eup %5722  ;;  %5458 = vmatmul.mubr.msk.f32.vlgmr.msra.gmra.mrb[32].mxu1 %vm2288_vm13, %v7139_v39  ;;  %5465 = vmatprep.subr.mxu1 %v5841_v4 }
 0x633   : > { %v3224_v41 = vmul.f32 0.6931472, %v5723_v54  ;;  %5728 = vlog2.f32 %v3192_v29  ;;  %5467 = vmatprep.mubr.msk.f32.mxu1 %vm5842_vm2, %v5841_v4 }
 0x635   : > { %5466 = vmatpush3.msra.mxu1 %v3224_v41 }
 0x636   : > { %v5725_v37 = vpop.eup %5724  ;;  %5468 = vmatmul.mubr.msk.f32.vlgmr.msra.gmra.mrb[34].mxu1 %vm2288_vm13, %v7139_v39  ;;  %5475 = vmatprep.subr.mxu1 %v5841_v4 }
 0x637   : > { %v3228_v8 = vmul.f32 0.6931472, %v5725_v37  ;;  %5477 = vmatprep.mubr.msk.f32.mxu1 %vm5842_vm2, %v5841_v4 }
 0x639   : > { %5476 = vmatpush3.msra.mxu1 %v3228_v8 }
 0x63a   : > { %v5727_v34 = vpop.eup %5726  ;;  %5478 = vmatmul.mubr.msk.f32.vlgmr.msra.gmra.mrb[36].mxu1 %vm2288_vm13, %v7139_v39  ;;  %5485 = vmatprep.subr.mxu1 %v5841_v4 }
 0x63b   : > { %v3232_v40 = vmul.f32 0.6931472, %v5727_v34  ;;  %5487 = vmatprep.mubr.msk.f32.mxu1 %vm5842_vm2, %v5841_v4 }
 0x63c   : > { %v3162_v19 = vpop.xlane.xlu1 %3161 }
 0x63d   : > { %v5729_v27 = vpop.eup %5728  ;;  %v3194_v15 = vadd.f32 1e-09, %v3162_v19  ;;  %5486 = vmatpush3.msra.mxu1 %v3232_v40 }
 0x63e   : > { %v3214_v7 = vmul.f32 0.6931472, %v5729_v27  ;;  %5488 = vmatmul.mubr.msk.f32.vlgmr.msra.gmra.mrb[38].mxu1 %vm2288_vm13, %v7139_v39 }
 0x63f   : > { %5730 = vlog2.f32 %v3194_v15 }
 0x640   : > { %v3168_v38 = vpop.xlane.xlu1 %3167  ;;  %5441 = vmatpush3.msra.mxu0 %v3214_v7 }
 0x641   : > { %v3196_v0 = vadd.f32 1e-09, %v3168_v38  ;;  %5443 = vmatmul.mubr.msk.f32.vlgmr.msra.gmra.mrb[28].mxu0 %vm2288_vm13, %v7139_v39  ;;  %5450 = vmatprep.subr.mxu0 %v5841_v4 }
 0x642   : > { %5452 = vmatprep.mubr.msk.f32.mxu0 %vm5842_vm2, %v5841_v4 }
 0x643   : > { %5732 = vlog2.f32 %v3196_v0 }
 0x644   : > { %v3174_v9 = vpop.xlane.xlu1 %3173 }
 0x645   : > { %v3198_v1 = vadd.f32 1e-09, %v3174_v9 }
 0x647   : > { %5734 = vlog2.f32 %v3198_v1 }
 0x648   : > { %v3180_v63 = vpop.xlane.xlu1 %3179 }
 0x649   : > { %v5731_v33 = vpop.eup %5730  ;;  %v3200_v51 = vadd.f32 1e-09, %v3180_v63 }
 0x64a   : > { %v3218_v56 = vmul.f32 0.6931472, %v5731_v33 }
 0x64b   : > { %5736 = vlog2.f32 %v3200_v51 }
 0x64c   : > { %v3186_v43 = vpop.xlane.xlu1 %3185  ;;  %5451 = vmatpush3.msra.mxu0 %v3218_v56 }
 0x64d   : > { %v5733_v58 = vpop.eup %5732  ;;  %v3202_v36 = vadd.f32 1e-09, %v3186_v43  ;;  %5453 = vmatmul.mubr.msk.f32.vlgmr.msra.gmra.mrb[30].mxu0 %vm2288_vm13, %v7139_v39  ;;  %5460 = vmatprep.subr.mxu0 %v5841_v4 }
 0x64e   : > { %v3222_v32 = vmul.f32 0.6931472, %v5733_v58  ;;  %5462 = vmatprep.mubr.msk.f32.mxu0 %vm5842_vm2, %v5841_v4 }
 0x64f   : > { %5738 = vlog2.f32 %v3202_v36 }
 0x650   : > { %5461 = vmatpush3.msra.mxu0 %v3222_v32 }
 0x651   : > { %v5735_v17 = vpop.eup %5734  ;;  %5463 = vmatmul.mubr.msk.f32.vlgmr.msra.gmra.mrb[32].mxu0 %vm2288_vm13, %v7139_v39  ;;  %5470 = vmatprep.subr.mxu0 %v5841_v4 }
 0x652   : > { %v3226_v23 = vmul.f32 0.6931472, %v5735_v17  ;;  %5472 = vmatprep.mubr.msk.f32.mxu0 %vm5842_vm2, %v5841_v4 }
 0x654   : > { %5471 = vmatpush3.msra.mxu0 %v3226_v23 }
 0x655   : > { %v5737_v59 = vpop.eup %5736  ;;  %5473 = vmatmul.mubr.msk.f32.vlgmr.msra.gmra.mrb[34].mxu0 %vm2288_vm13, %v7139_v39  ;;  %5480 = vmatprep.subr.mxu0 %v5841_v4 }
 0x656   : > { %v3230_v45 = vmul.f32 0.6931472, %v5737_v59  ;;  %5482 = vmatprep.mubr.msk.f32.mxu0 %vm5842_vm2, %v5841_v4 }
 0x658   : > { %5481 = vmatpush3.msra.mxu0 %v3230_v45 }
 0x659   : > { %v5739_v22 = vpop.eup %5738  ;;  %5483 = vmatmul.mubr.msk.f32.vlgmr.msra.gmra.mrb[36].mxu0 %vm2288_vm13, %v7139_v39  ;;  %5490 = vmatprep.subr.mxu0 %v5841_v4 }
 0x65a   : > { %v3234_v53 = vmul.f32 0.6931472, %v5739_v22  ;;  %5492 = vmatprep.mubr.msk.f32.mxu0 %vm5842_vm2, %v5841_v4  ;;  %vm7250_vm2 = vcmp.gt.s32.totalorder %v6557_v35, %v6554_v5 }
 0x65c   : > { %5491 = vmatpush3.msra.mxu0 %v3234_v53 }
 0x65d   : > { %5493 = vmatmul.mubr.msk.f32.vlgmr.msra.gmra.mrb[38].mxu0 %vm2288_vm13, %v7139_v39 }
 0x6e2   : > { %v3304_v60 = vpop.f32.mrb[24].mxu1 }
 0x6e3   : > { %4358 = vxpose.xlu0.b32.start.end [1/1] (short) (narrow) %v3304_v60, 8  ;;  %v5419_v48 = vpop.f32.mrb[25].mxu1 }
 0x6e6   : > { %v3374_v49 = vpop.f32.mrb[24].mxu0 }
 0x6e7   : > { %4390 = vxpose.xlu1.b32.start.end [1/1] (short) (narrow) %v3374_v49, 8  ;;  %v5424_v10 = vpop.f32.mrb[25].mxu0 }
 0x6ea   : > { %v3444_v61 = vpop.f32.mrb[26].mxu1 }
 0x6eb   : > { %4422 = vxpose.xlu0.b32.start.end [1/1] (short) (narrow) %v3444_v61, 8  ;;  %v5429_v2 = vpop.f32.mrb[27].mxu1 }
 0x6ee   : > { %v3514_v20 = vpop.f32.mrb[26].mxu0 }
 0x6ef   : > { %4454 = vxpose.xlu0.b32.start.end [1/1] (short) (narrow) %v3514_v20, 8  ;;  %v5434_v18 = vpop.f32.mrb[27].mxu0 }
 0x6f2   : > { %v3584_v44 = vpop.f32.mrb[28].mxu1 }
 0x6f3   : > { %4486 = vxpose.xlu1.b32.start.end [1/1] (short) (narrow) %v3584_v44, 8  ;;  %v5439_v57 = vpop.f32.mrb[29].mxu1 }
 0x6fa   : > { %v7215_v4 = vpop.f32.mrb[30].mxu1 }
 0x6fb   : > { %4550 = vxpose.xlu1.b32.start.end [1/1] (short) (narrow) %v7215_v4, 8  ;;  %v5449_v39 = vpop.f32.mrb[31].mxu1 }
 0x705   : > { %v7218_v42 = vpop.f32.mrb[32].mxu1 }
 0x706   : > { %4614 = vxpose.xlu1.b32.start.end [1/1] (short) (narrow) %v7218_v42, 8  ;;  %v5459_v31 = vpop.f32.mrb[33].mxu1 }
 0x709   : > { %v7221_v12 = vpop.f32.mrb[34].mxu1 }
 0x70a   : > { %4678 = vxpose.xlu1.b32.start.end [1/1] (short) (narrow) %v7221_v12, 8  ;;  %v5469_v13 = vpop.f32.mrb[35].mxu1 }
 0x70d   : > { %v7224_v26 = vpop.f32.mrb[36].mxu1 }
 0x70e   : > { %4742 = vxpose.xlu1.b32.start.end [1/1] (short) (narrow) %v7224_v26, 8  ;;  %v5479_v29 = vpop.f32.mrb[37].mxu1 }
 0x711   : > { %v7227_v54 = vpop.f32.mrb[38].mxu1 }
 0x712   : > { %4806 = vxpose.xlu1.b32.start.end [1/1] (short) (narrow) %v7227_v54, 8  ;;  %v5489_v41 = vpop.f32.mrb[39].mxu1 }
 0x714   : > { %v7230_v37 = vpop.f32.mrb[28].mxu0 }
 0x715   : > { %4518 = vxpose.xlu0.b32.start.end [1/1] (short) (narrow) %v7230_v37, 8  ;;  %v5444_v8 = vpop.f32.mrb[29].mxu0 }
 0x720   : > { %v7233_v34 = vpop.f32.mrb[30].mxu0 }
 0x721   : > { %4582 = vxpose.xlu0.b32.start.end [1/1] (short) (narrow) %v7233_v34, 8  ;;  %v5454_v40 = vpop.f32.mrb[31].mxu0 }
 0x724   : > { %v7236_v19 = vpop.f32.mrb[32].mxu0 }
 0x725   : > { %4646 = vxpose.xlu0.b32.start.end [1/1] (short) (narrow) %v7236_v19, 8  ;;  %v5464_v27 = vpop.f32.mrb[33].mxu0 }
 0x728   : > { %v7239_v15 = vpop.f32.mrb[34].mxu0 }
 0x729   : > { %4710 = vxpose.xlu0.b32.start.end [1/1] (short) (narrow) %v7239_v15, 8  ;;  %v5474_v7 = vpop.f32.mrb[35].mxu0 }
 0x72c   : > { %v7242_v38 = vpop.f32.mrb[36].mxu0 }
 0x72d   : > { %4774 = vxpose.xlu0.b32.start.end [1/1] (short) (narrow) %v7242_v38, 8  ;;  %v5484_v0 = vpop.f32.mrb[37].mxu0 }
 0x730   : > { %v7245_v9 = vpop.f32.mrb[38].mxu0 }
 0x731   : > { %4838 = vxpose.xlu0.b32.start.end [1/1] (short) (narrow) %v7245_v9, 8  ;;  %v5494_v1 = vpop.f32.mrb[39].mxu0 }
 0x763   : > { %v4374_v63 = vpop.trf.xlu0 }
 0x764   : > { %v4870_v33 = vsub.f32 %v4374_v63, %v3304_v60 }
 0x766   : > { %v4887_v56 = vsub.f32 0.0, %v4870_v33 }
 0x767   : > { %v4406_v43 = vpop.trf.xlu1 }
 0x768   : > { %v4905_v58 = vsel %vm7250_vm2, %v4870_v33, %v4887_v56  ;;  %v4871_v36 = vsub.f32 %v4406_v43, %v3374_v49 }
 0x769   : > { %v4921_v32 = vmul.f32 1.442695, %v4905_v58 }
 0x76a   : > { %v4888_v17 = vsub.f32 0.0, %v4871_v36 }
 0x76b   : > { %5740 = vpow2.f32 %v4921_v32  ;;  %v4438_v23 = vpop.trf.xlu0 }
 0x76c   : > { %v4906_v59 = vsel %vm7250_vm2, %v4871_v36, %v4888_v17  ;;  %v4872_v45 = vsub.f32 %v4438_v23, %v3444_v61 }
 0x76d   : > { %v4923_v22 = vmul.f32 1.442695, %v4906_v59 }
 0x76e   : > { %v4889_v53 = vsub.f32 0.0, %v4872_v45 }
 0x76f   : > { %5742 = vpow2.f32 %v4923_v22  ;;  %v4470_v60 = vpop.trf.xlu0 }
 0x770   : > { %v4907_v48 = vsel %vm7250_vm2, %v4872_v45, %v4889_v53  ;;  %v4873_v10 = vsub.f32 %v4470_v60, %v3514_v20 }
 0x771   : > { %v4925_v2 = vmul.f32 1.442695, %v4907_v48 }
 0x772   : > { %v4890_v18 = vsub.f32 0.0, %v4873_v10 }
 0x773   : > { %5744 = vpow2.f32 %v4925_v2  ;;  %v4502_v49 = vpop.trf.xlu1 }
 0x774   : > { %v4908_v57 = vsel %vm7250_vm2, %v4873_v10, %v4890_v18  ;;  %v4874_v39 = vsub.f32 %v4502_v49, %v3584_v44 }
 0x775   : > { %v5741_v31 = vpop.eup %5740  ;;  %v4927_v13 = vmul.f32 1.442695, %v4908_v57 }
 0x776   : > { %v4953_v20 = vadd.f32 1e-09, %v5741_v31  ;;  %v4891_v29 = vsub.f32 0.0, %v4874_v39 }
 0x777   : > { %5746 = vpow2.f32 %v4927_v13 }
 0x778   : > { %v4971_v44 = vsel %vm7264_vm7, %v6940_v62, %v4953_v20  ;;  %v4909_v5 = vsel %vm7250_vm2, %v4874_v39, %v4891_v29 }
 0x779   : > { %v5743_v35 = vpop.eup %5742  ;;  %4987 = vst.msk [vmem:[%s7273_s11] sm:$0xff] %vm2288_vm13, %v4971_v44  ;;  %v4929_v41 = vmul.f32 1.442695, %v4909_v5 }
 0x77a   : > { %v4954_v8 = vadd.f32 1e-09, %v5743_v35 }
 0x77b   : > { %5748 = vpow2.f32 %v4929_v41  ;;  %v4566_v40 = vpop.trf.xlu1 }
 0x77c   : > { %v4972_v27 = vsel %vm7264_vm7, %v6949_v50, %v4954_v8  ;;  %v4876_v7 = vsub.f32 %v4566_v40, %v7215_v4 }
 0x77d   : > { %v5745_v0 = vpop.eup %5744  ;;  %4988 = vst.msk [vmem:[%s7273_s11 + $0x8] sm:$0xff] %vm2288_vm13, %v4972_v27 }
 0x77e   : > { %v4955_v62 = vadd.f32 1e-09, %v5745_v0  ;;  %v4893_v1 = vsub.f32 0.0, %v4876_v7 }
 0x780   : > { %v4973_v63 = vsel %vm7264_vm7, %v6959_v24, %v4955_v62  ;;  %v4911_v33 = vsel %vm7250_vm2, %v4876_v7, %v4893_v1 }
 0x781   : > { %v5747_v56 = vpop.eup %5746  ;;  %4989 = vst.msk [vmem:[%s7273_s11 + $0x10] sm:$0xff] %vm2288_vm13, %v4973_v63  ;;  %v4933_v43 = vmul.f32 1.442695, %v4911_v33 }
 0x782   : > { %v4956_v50 = vadd.f32 1e-09, %v5747_v56 }
 0x783   : > { %5750 = vpow2.f32 %v4933_v43 }
 0x784   : > { %v4974_v4 = vsel %vm7264_vm7, %v6968_v25, %v4956_v50 }
 0x785   : > { %v5749_v58 = vpop.eup %5748  ;;  %4990 = vst.msk [vmem:[%s7273_s11 + $0x18] sm:$0xff] %vm2288_vm13, %v4974_v4 }
 0x786   : > { %v4957_v36 = vadd.f32 1e-09, %v5749_v58  ;;  %v4630_v32 = vpop.trf.xlu1 }
 0x787   : > { %v4878_v24 = vsub.f32 %v4630_v32, %v7218_v42 }
 0x788   : > { %v4975_v17 = vsel %vm7264_vm7, %v6978_v16, %v4957_v36 }
 0x789   : > { %4991 = vst.msk [vmem:[%s7273_s11 + $0x20] sm:$0xff] %vm2288_vm13, %v4975_v17  ;;  %v4895_v23 = vsub.f32 0.0, %v4878_v24 }
 0x78a   : > { %v4694_v59 = vpop.trf.xlu1 }
 0x78b   : > { %v4913_v45 = vsel %vm7250_vm2, %v4878_v24, %v4895_v23  ;;  %v4880_v25 = vsub.f32 %v4694_v59, %v7221_v12 }
 0x78c   : > { %v4937_v22 = vmul.f32 1.442695, %v4913_v45 }
 0x78d   : > { %v5751_v53 = vpop.eup %5750  ;;  %v4897_v60 = vsub.f32 0.0, %v4880_v25 }
 0x78e   : > { %v4959_v48 = vadd.f32 1e-09, %v5751_v53  ;;  %5752 = vpow2.f32 %v4937_v22  ;;  %v4758_v42 = vpop.trf.xlu1 }
 0x78f   : > { %v4915_v10 = vsel %vm7250_vm2, %v4880_v25, %v4897_v60  ;;  %v4882_v16 = vsub.f32 %v4758_v42, %v7224_v26 }
 0x790   : > { %v4977_v2 = vsel %vm7264_vm7, %v6989_v52, %v4959_v48  ;;  %v4941_v18 = vmul.f32 1.442695, %v4915_v10 }
 0x791   : > { %4993 = vst.msk [vmem:[%s7273_s11 + $0x30] sm:$0xff] %vm2288_vm13, %v4977_v2  ;;  %v4899_v49 = vsub.f32 0.0, %v4882_v16 }
 0x792   : > { %5754 = vpow2.f32 %v4941_v18  ;;  %v4822_v12 = vpop.trf.xlu1 }
 0x793   : > { %v4917_v57 = vsel %vm7250_vm2, %v4882_v16, %v4899_v49  ;;  %v4884_v39 = vsub.f32 %v4822_v12, %v7227_v54 }
 0x794   : > { %v4945_v31 = vmul.f32 1.442695, %v4917_v57 }
 0x795   : > { %v4901_v13 = vsub.f32 0.0, %v4884_v39  ;;  %v4534_v20 = vpop.trf.xlu0 }
 0x796   : > { %5756 = vpow2.f32 %v4945_v31  ;;  %v4875_v26 = vsub.f32 %v4534_v20, %v7230_v37 }
 0x797   : > { %v4919_v52 = vsel %vm7250_vm2, %v4884_v39, %v4901_v13 }
 0x798   : > { %v5753_v29 = vpop.eup %5752  ;;  %v4949_v44 = vmul.f32 1.442695, %v4919_v52  ;;  %v4892_v5 = vsub.f32 0.0, %v4875_v26 }
 0x799   : > { %v4961_v35 = vadd.f32 1e-09, %v5753_v29 }
 0x79a   : > { %5758 = vpow2.f32 %v4949_v44  ;;  %v4910_v54 = vsel %vm7250_vm2, %v4875_v26, %v4892_v5 }
 0x79b   : > { %v4979_v41 = vsel %vm7264_vm7, %v7013_v6, %v4961_v35  ;;  %v4931_v8 = vmul.f32 1.442695, %v4910_v54 }
 0x79c   : > { %v5755_v40 = vpop.eup %5754  ;;  %4995 = vst.msk [vmem:[%s7273_s11 + $0x40] sm:$0xff] %vm2288_vm13, %v4979_v41 }
 0x79d   : > { %v4963_v37 = vadd.f32 1e-09, %v5755_v40  ;;  %5760 = vpow2.f32 %v4931_v8 }
 0x79f   : > { %v4981_v27 = vsel %vm7264_vm7, %v7031_v55, %v4963_v37 }
 0x7a0   : > { %v5757_v7 = vpop.eup %5756  ;;  %4997 = vst.msk [vmem:[%s7273_s11 + $0x50] sm:$0xff] %vm2288_vm13, %v4981_v27 }
 0x7a1   : > { %v4965_v0 = vadd.f32 1e-09, %v5757_v7  ;;  %v4598_v62 = vpop.trf.xlu0 }
 0x7a2   : > { %v4877_v1 = vsub.f32 %v4598_v62, %v7233_v34 }
 0x7a3   : > { %v4983_v6 = vsel %vm7264_vm7, %v7048_v30, %v4965_v0 }
 0x7a4   : > { %v5759_v63 = vpop.eup %5758  ;;  %4999 = vst.msk [vmem:[%s7273_s11 + $0x60] sm:$0xff] %vm2288_vm13, %v4983_v6  ;;  %v4894_v33 = vsub.f32 0.0, %v4877_v1 }
 0x7a5   : > { %v4967_v56 = vadd.f32 1e-09, %v5759_v63  ;;  %v4662_v43 = vpop.trf.xlu0 }
 0x7a6   : > { %v4912_v55 = vsel %vm7250_vm2, %v4877_v1, %v4894_v33  ;;  %v4879_v50 = vsub.f32 %v4662_v43, %v7236_v19 }
 0x7a7   : > { %v5761_v4 = vpop.eup %5760  ;;  %v4985_v34 = vsel %vm7264_vm7, %v7069_v11, %v4967_v56  ;;  %v4935_v58 = vmul.f32 1.442695, %v4912_v55 }
 0x7a8   : > { %5001 = vst.msk [vmem:[%s7273_s11 + $0x70] sm:$0xff] %vm2288_vm13, %v4985_v34  ;;  %v4958_v30 = vadd.f32 1e-09, %v5761_v4  ;;  %v4896_v36 = vsub.f32 0.0, %v4879_v50 }
 0x7a9   : > { %5762 = vpow2.f32 %v4935_v58  ;;  %v4726_v32 = vpop.trf.xlu0 }
 0x7aa   : > { %v4976_v24 = vsel %vm7264_vm7, %v7086_v3, %v4958_v30  ;;  %v4914_v17 = vsel %vm7250_vm2, %v4879_v50, %v4896_v36  ;;  %v4881_v19 = vsub.f32 %v4726_v32, %v7239_v15 }
 0x7ab   : > { %4992 = vst.msk [vmem:[%s7273_s11 + $0x28] sm:$0xff] %vm2288_vm13, %v4976_v24  ;;  %v4939_v23 = vmul.f32 1.442695, %v4914_v17 }
 0x7ac   : > { %v4898_v11 = vsub.f32 0.0, %v4881_v19 }
 0x7ad   : > { %5764 = vpow2.f32 %v4939_v23  ;;  %v4790_v59 = vpop.trf.xlu0 }
 0x7ae   : > { %v4916_v45 = vsel %vm7250_vm2, %v4881_v19, %v4898_v11  ;;  %v4883_v25 = vsub.f32 %v4790_v59, %v7242_v38 }
 0x7af   : > { %v4943_v22 = vmul.f32 1.442695, %v4916_v45 }
 0x7b0   : > { %v4900_v53 = vsub.f32 0.0, %v4883_v25 }
 0x7b1   : > { %5766 = vpow2.f32 %v4943_v22  ;;  %v4854_v3 = vpop.trf.xlu0 }
 0x7b2   : > { %v4918_v60 = vsel %vm7250_vm2, %v4883_v25, %v4900_v53  ;;  %v4885_v15 = vsub.f32 %v4854_v3, %v7245_v9 }
 0x7b3   : > { %v5763_v48 = vpop.eup %5762  ;;  %v4947_v42 = vmul.f32 1.442695, %v4918_v60 }
 0x7b4   : > { %v4960_v10 = vadd.f32 1e-09, %v5763_v48  ;;  %v4902_v16 = vsub.f32 0.0, %v4885_v15 }
 0x7b5   : > { %5768 = vpow2.f32 %v4947_v42 }
 0x7b6   : > { %v4978_v38 = vsel %vm7264_vm7, %v7110_v14, %v4960_v10  ;;  %v4920_v2 = vsel %vm7250_vm2, %v4885_v15, %v4902_v16 }
 0x7b7   : > { %v5765_v18 = vpop.eup %5764  ;;  %4994 = vst.msk [vmem:[%s7273_s11 + $0x38] sm:$0xff] %vm2288_vm13, %v4978_v38  ;;  %v4951_v49 = vmul.f32 1.442695, %v4920_v2 }
 0x7b8   : > { %v4962_v9 = vadd.f32 1e-09, %v5765_v18 }
 0x7b9   : > { %5770 = vpow2.f32 %v4951_v49 }
 0x7ba   : > { %v4980_v12 = vsel %vm7264_vm7, %v7015_v21, %v4962_v9 }
 0x7bb   : > { %v5767_v57 = vpop.eup %5766  ;;  %4996 = vst.msk [vmem:[%s7273_s11 + $0x48] sm:$0xff] %vm2288_vm13, %v4980_v12 }
 0x7bc   : > { %v4964_v39 = vadd.f32 1e-09, %v5767_v57 }
 0x7be   : > { %v4982_v14 = vsel %vm7264_vm7, %v7067_v46, %v4964_v39 }
 0x7bf   : > { %v5769_v51 = vpop.eup %5768  ;;  %4998 = vst.msk [vmem:[%s7273_s11 + $0x58] sm:$0xff] %vm2288_vm13, %v4982_v14 }
 0x7c0   : > { %v4966_v31 = vadd.f32 1e-09, %v5769_v51 }
 0x7c2   : > { %v4984_v13 = vsel %vm7264_vm7, %v7100_v28, %v4966_v31 }
 0x7c3   : > { %v5771_v20 = vpop.eup %5770  ;;  %5000 = vst.msk [vmem:[%s7273_s11 + $0x68] sm:$0xff] %vm2288_vm13, %v4984_v13 }
 0x7c4   : > { %v4968_v21 = vadd.f32 1e-09, %v5771_v20 }
 0x7c6   : > { %v4986_v26 = vsel %vm7264_vm7, %v7105_v47, %v4968_v21 }
 0x7c7   : > { %5002 = vst.msk [vmem:[%s7273_s11 + $0x78] sm:$0xff] %vm2288_vm13, %v4986_v26 }
 0x7c8 PF: > { %p18_p8 = scmp.ge.s32.totalorder %s5905_s29, 4   ;;  %s7499_s24 = smov %s5828_s25 }
 0x7c9   : > { %s7500_s25 = smov %s5832_s26  ;;  %s7501_s26 = smov %s5915_s9 }
 0x7ca   : > { %s7502_s27 = smov %s5905_s29  ;;  %20 = sbr.rel (!%p18_p8) target bundleno = 3 (0x3), region = 99 }
 0x7d1   :  { %5058 = vsyncpa [#allocation3], 1 }
 0x7d2   :  { %5060 = vsyncpa [#allocation3 + $0x1], 1 }

</bundles_post_ra>
